<compile_context>
chip_gen: v7x
topology: tpu7x:2x2x1
jax: 0.10.0
libtpu: 0.0.40
codegen_flags: <defaults>
</compile_context>

<pallas_src>
import jax
import jax.numpy as jnp
import numpy as np
from jax.experimental import pallas as pl
from jax.experimental.pallas import tpu as pltpu

KH = KW = 4
STRIDE = 2
PAD = 1


# ----------------------------------------------------------------------------
# Pallas kernel: per-tap accumulated conv for one group of images.
# ----------------------------------------------------------------------------
def _encode_kernel(p00_ref, p01_ref, p10_ref, p11_ref, w_ref, b_ref, o_ref):
    """p<ph><pw>_ref : (nb, Ho+1, Wo+1, C) bf16 — parity planes of padded NHWC image
       w_ref         : (KH*KW*C, Z)      bf16 — tap-major block-diagonal weights
       b_ref         : (1, Z)            f32  — concatenated biases
       o_ref         : (nb, Ho*Wo, Z)    f32  — dense, unpadded latents (NHWC order)
    """
    nb, hp1, wp1, C = p00_ref.shape
    Ho, Wo = hp1 - 1, wp1 - 1
    Z = o_ref.shape[-1]
    rows = nb * Ho * Wo

    plane_refs = (p00_ref, p01_ref, p10_ref, p11_ref)
    w = w_ref[...]                                   # (16*C, Z) bf16, grid-invariant

    acc = jnp.zeros((rows, Z), jnp.float32)
    # TODO(synk): on v7x the 16 partial matmuls could accumulate in-place in the MRB.
    for kh in range(KH):
        for kw in range(KW):
            p_ref = plane_refs[(kh % 2) * 2 + (kw % 2)]
            dh, dw = kh // 2, kw // 2
            # tap window: x_pad[b, 2*ho+kh, 2*wo+kw, c] == plane[b, ho+dh, wo+dw, c]
            x_t = p_ref[:, dh:dh + Ho, dw:dw + Wo, :].reshape(rows, C)
            w_t = w[(kh * KW + kw) * C:(kh * KW + kw + 1) * C, :]
            acc = acc + jnp.dot(x_t, w_t, preferred_element_type=jnp.float32)

    acc = jnp.maximum(acc + b_ref[...], 0.0)         # f32 epilogue (v5e VPU safe)
    o_ref[...] = acc.reshape(nb, Ho * Wo, Z).astype(o_ref.dtype)


# ----------------------------------------------------------------------------
# Host-side (numpy) assembly of the fused parameters — done once, cached.
# ----------------------------------------------------------------------------
def _build_fused_params(ae_list, ch_list):
    c_sizes = [len(ch) for ch in ch_list]
    C_tot = sum(c_sizes)
    Z_tot = sum(int(np.asarray(ae.weight).shape[0]) for ae in ae_list)
    all_ch = np.asarray([c for ch in ch_list for c in ch], dtype=np.int32)

    w_flat = np.zeros((KH * KW * C_tot, Z_tot), np.float32)
    b_flat = np.zeros((1, Z_tot), np.float32)
    c_off = z_off = 0
    for ae, ch in zip(ae_list, ch_list):
        w = np.asarray(ae.weight, np.float32)        # (Z_i, C_i, KH, KW) OIHW
        Zi, Ci = int(w.shape[0]), int(w.shape[1])
        assert Ci == len(ch), "channel list does not match AE input channel count"
        for kh in range(KH):
            for kw in range(KW):
                r0 = (kh * KW + kw) * C_tot + c_off
                w_flat[r0:r0 + Ci, z_off:z_off + Zi] = w[:, :, kh, kw].T
        b_flat[0, z_off:z_off + Zi] = np.asarray(ae.bias, np.float32)
        c_off += Ci
        z_off += Zi
    assert c_off == C_tot and z_off == Z_tot
    return (all_ch, jnp.asarray(w_flat, jnp.bfloat16),
            jnp.asarray(b_flat, jnp.float32), C_tot, Z_tot)


def _images_per_block(B, rows_per_image, target_rows=1024, max_nb=8):
    nb = max(1, min(max_nb, target_rows // max(1, rows_per_image)))
    if B >= 2:
        nb = min(nb, max(1, B // 2))     # keep >= 2 grid steps (megacore / v7x 2 TCs)
    nb = min(nb, B)
    while B % nb:                        # largest divisor of B not above target
        nb -= 1
    return nb


# ----------------------------------------------------------------------------
# Fused multi-AE forward: one pallas_call for every registered auto-encoder.
# ----------------------------------------------------------------------------
def fused_multi_channel_encode(x, params, *, nhwc_output=False):
    """x: (B, C, H, W) f32. Returns (B, sum_i Z_i, H/2, W/2) f32 (NCHW)."""
    all_ch, w_flat, b_flat, C_tot, Z_tot = params
    B, _, H, W = x.shape
    assert H % 2 == 0 and W % 2 == 0, "k=4, stride=2, pad=1 conv expects even H, W"
    Ho, Wo = H // 2, W // 2

    # Channel gather -> NHWC -> pad -> bf16 -> parity split: one cheap pass over
    # the input; no duplicated im2col matrix ever touches HBM.
    x_sel = jnp.transpose(x[:, all_ch, :, :], (0, 2, 3, 1)).astype(jnp.bfloat16)
    x_pad = jnp.pad(x_sel, ((0, 0), (PAD, PAD), (PAD, PAD), (0, 0)))
    planes = tuple(x_pad[:, ph::2, pw::2, :] for ph in (0, 1) for pw in (0, 1))
    # each plane: (B, Ho+1, Wo+1, C_tot)

    nb = _images_per_block(B, Ho * Wo)
    grid = (B // nb,)

    plane_spec = pl.BlockSpec((nb, Ho + 1, Wo + 1, C_tot), lambda i: (i, 0, 0, 0))
    # TODO(synk): mark w/b grid-invariant buffers with pipeline_mode=pl.Buffered(1)
    #             to halve their resident VMEM once K*Z grows (v7x 64 MiB budget).
    # TODO(synk): for >4 sub-AEs add a per-AE grid axis driven by scalar-prefetched
    #             K/Z offsets so each step only multiplies its own (Ki, Zi) slice.
    w_spec = pl.BlockSpec((KH * KW * C_tot, Z_tot), lambda i: (0, 0))
    b_spec = pl.BlockSpec((1, Z_tot), lambda i: (0, 0))
    out_spec = pl.BlockSpec((nb, Ho * Wo, Z_tot), lambda i: (i, 0, 0))

    # Real double-buffered footprint, 1.5x margin, capped well below v7x's 64 MiB.
    plane_bytes = nb * (Ho + 1) * (Wo + 1) * C_tot * 2
    footprint = (4 * 2 * plane_bytes                        # 4 planes, dbl-buffered
                 + 2 * nb * Ho * Wo * Z_tot * 4             # output blocks
                 + 2 * (int(w_flat.size) * 2 + Z_tot * 4)   # weights + bias
                 + 4 * nb * Ho * Wo * max(Z_tot, 8) * 4)    # accumulator temporaries
    vmem_limit = int(min(48 << 20, max(4 << 20, int(1.5 * footprint) + (2 << 20))))

    cost = pl.CostEstimate(
        flops=2 * B * Ho * Wo * (KH * KW * C_tot) * Z_tot,
        transcendentals=0,
        bytes_accessed=(4 * B * (Ho + 1) * (Wo + 1) * C_tot * 2
                        + int(w_flat.size) * 2 + Z_tot * 4
                        + B * Ho * Wo * Z_tot * 4),
    )

    out = pl.pallas_call(
        _encode_kernel,
        out_shape=jax.ShapeDtypeStruct((B, Ho * Wo, Z_tot), jnp.float32),
        grid_spec=pltpu.PrefetchScalarGridSpec(
            num_scalar_prefetch=0,
            grid=grid,
            in_specs=[plane_spec, plane_spec, plane_spec, plane_spec,
                      w_spec, b_spec],
            out_specs=out_spec,
        ),
        compiler_params=pltpu.CompilerParams(
            dimension_semantics=("parallel",),
            vmem_limit_bytes=vmem_limit,
        ),
        cost_estimate=cost,
    )(*planes, w_flat, b_flat)

    z_nhwc = out.reshape(B, Ho, Wo, Z_tot)
    if nhwc_output:          # consumers that accept NHWC skip the transpose pass
        return z_nhwc
    return jnp.transpose(z_nhwc, (0, 3, 1, 2))      # single NHWC->NCHW pass


# ----------------------------------------------------------------------------
# Synthetic sub auto-encoder (stands in for the external BaseAE; only .encode
# is needed by MultiChannelAE.forward).
# ----------------------------------------------------------------------------
class ConvEncoderAE:
    def __init__(self, weight, bias):
        self.weight = weight       # (Z, C, 4, 4) — PyTorch OIHW
        self.bias = bias           # (Z,)

    def encode(self, x):
        params = _build_fused_params([self], [list(range(x.shape[1]))])
        return fused_multi_channel_encode(x, params)


# ----------------------------------------------------------------------------
# MultiChannelAE — same forward semantics as the PyTorch module, but all
# sub-encoders run in one fused Pallas kernel.
# ----------------------------------------------------------------------------
class MultiChannelAE:
    def __init__(self):
        self.ae_l = []
        self.ch_l = []
        self.decode_ch_l = []
        self._params = None

    def add_ae(self, auto_encoder, channels, decoder_channels=None):
        self.ae_l.append(auto_encoder)
        self.ch_l.append(list(channels))
        self.decode_ch_l.append(decoder_channels)
        self._params = None                         # invalidate cached fused params

    def forward(self, x):
        # == torch.cat([ae.encode(x[:, ch]) for ch, ae in zip(...)], dim=1)
        if self._params is None:                    # host-side assembly, once
            self._params = _build_fused_params(self.ae_l, self.ch_l)
        return fused_multi_channel_encode(x, self._params)

    __call__ = forward
    # TODO(synk): decode() needs the (external) BaseAE decoders; not part of the
    #             forward pass being reproduced here.


# ----------------------------------------------------------------------------
# Pure-JAX reference for one sub-encoder (correctness check only, f32).
# ----------------------------------------------------------------------------
def _ref_encode(x, weight, bias):
    y = jax.lax.conv_general_dilated(
        x, weight, window_strides=(STRIDE, STRIDE),
        padding=[(PAD, PAD), (PAD, PAD)],
        dimension_numbers=("NCHW", "OIHW", "NCHW"))
    return jnp.maximum(y + bias[None, :, None, None], 0.0)


if __name__ == "__main__":
    B, C, H, W = 2, 4, 16, 16
    x = jax.random.normal(jax.random.PRNGKey(0), (B, C, H, W), jnp.float32)

    k1, k2, k3, k4 = jax.random.split(jax.random.PRNGKey(1), 4)
    # AE #1: encodes channels [0, 1] -> 3 latent channels
    ae1 = ConvEncoderAE(
        weight=0.1 * jax.random.normal(k1, (3, 2, KH, KW), jnp.float32),
        bias=0.05 * jax.random.normal(k2, (3,), jnp.float32))
    # AE #2: encodes channels [2, 3] -> 5 latent channels
    ae2 = ConvEncoderAE(
        weight=0.1 * jax.random.normal(k3, (5, 2, KH, KW), jnp.float32),
        bias=0.05 * jax.random.normal(k4, (5,), jnp.float32))

    mc = MultiChannelAE()
    mc.add_ae(ae1, [0, 1])
    mc.add_ae(ae2, [2, 3])

    z = jax.block_until_ready(mc.forward(x))
    assert z.shape == (B, 3 + 5, H // 2, W // 2), z.shape

    # Verify against pure-JAX f32 reference (torch.cat([enc1, enc2], dim=1)).
    z_ref = jnp.concatenate(
        [_ref_encode(x[:, [0, 1]], ae1.weight, ae1.bias),
         _ref_encode(x[:, [2, 3]], ae2.weight, ae2.bias)], axis=1)
    # bf16 MXU operands (f32 accumulation) -> tolerance loosened vs f32 ref.
    assert jnp.allclose(z, z_ref, rtol=2e-2, atol=2e-2), \
        float(jnp.max(jnp.abs(z - z_ref)))

    print("KERNEL_OK")
</pallas_src>

<mosaic_0001>
module attributes {stable_mosaic.version = 11 : i64} {
  func.func @_encode_kernel(%arg0: i32, %arg1: memref<1x9x9x4xbf16, #tpu.memory_space<vmem>>, %arg2: memref<1x9x9x4xbf16, #tpu.memory_space<vmem>>, %arg3: memref<1x9x9x4xbf16, #tpu.memory_space<vmem>>, %arg4: memref<1x9x9x4xbf16, #tpu.memory_space<vmem>>, %arg5: memref<64x8xbf16, #tpu.memory_space<vmem>>, %arg6: memref<1x8xf32, #tpu.memory_space<vmem>>, %arg7: memref<1x64x8xf32, #tpu.memory_space<vmem>>) attributes {dimension_semantics = [#tpu.dimension_semantics<parallel>], iteration_bounds = array<i64: 2>, scalar_prefetch = 0 : i64, scratch_operands = 0 : i64, tpu.core_type = #tpu.core_type<tc>, window_params = [{transform_indices = @transform_0, window_bounds = array<i64: 1, 9, 9, 4>}, {transform_indices = @transform_1, window_bounds = array<i64: 1, 9, 9, 4>}, {transform_indices = @transform_2, window_bounds = array<i64: 1, 9, 9, 4>}, {transform_indices = @transform_3, window_bounds = array<i64: 1, 9, 9, 4>}, {pipeline_mode = #tpu.pipeline_mode<synchronous>, transform_indices = @transform_4, window_bounds = array<i64: 64, 8>}, {pipeline_mode = #tpu.pipeline_mode<synchronous>, transform_indices = @transform_5, window_bounds = array<i64: 1, 8>}, {transform_indices = @transform_6, window_bounds = array<i64: 1, 64, 8>}]} {
    %c0 = arith.constant 0 : index
    %c0_0 = arith.constant 0 : index
    %0 = vector.load %arg5[%c0, %c0_0] : memref<64x8xbf16, #tpu.memory_space<vmem>>, vector<64x8xbf16>
    %cst = arith.constant 0.000000e+00 : f32
    %1 = vector.broadcast %cst : f32 to vector<64x8xf32>
    %c0_1 = arith.constant 0 : index
    %c0_2 = arith.constant 0 : index
    %c0_3 = arith.constant 0 : index
    %c0_4 = arith.constant 0 : index
    %2 = vector.load %arg1[%c0_1, %c0_2, %c0_3, %c0_4] : memref<1x9x9x4xbf16, #tpu.memory_space<vmem>>, vector<1x8x8x4xbf16>
    %3 = vector.shape_cast %2 : vector<1x8x8x4xbf16> to vector<64x4xbf16>
    %4 = vector.extract_strided_slice %0 {offsets = [0, 0], sizes = [4, 8], strides = [1, 1]} : vector<64x8xbf16> to vector<4x8xbf16>
    %cst_5 = arith.constant dense<0.000000e+00> : vector<64x8xf32>
    %5 = tpu.matmul %3, %4, %cst_5 {dimension_numbers = #tpu.dot_dimension_numbers<[1], [0], [0], [1], [0, 0, 1, 1], [], []>} : vector<64x4xbf16>, vector<4x8xbf16>, vector<64x8xf32> -> vector<64x8xf32>
    %6 = arith.addf %1, %5 : vector<64x8xf32>
    %c0_6 = arith.constant 0 : index
    %c0_7 = arith.constant 0 : index
    %c0_8 = arith.constant 0 : index
    %c0_9 = arith.constant 0 : index
    %7 = vector.load %arg2[%c0_6, %c0_7, %c0_8, %c0_9] : memref<1x9x9x4xbf16, #tpu.memory_space<vmem>>, vector<1x8x8x4xbf16>
    %8 = vector.shape_cast %7 : vector<1x8x8x4xbf16> to vector<64x4xbf16>
    %9 = vector.extract_strided_slice %0 {offsets = [4, 0], sizes = [4, 8], strides = [1, 1]} : vector<64x8xbf16> to vector<4x8xbf16>
    %cst_10 = arith.constant dense<0.000000e+00> : vector<64x8xf32>
    %10 = tpu.matmul %8, %9, %cst_10 {dimension_numbers = #tpu.dot_dimension_numbers<[1], [0], [0], [1], [0, 0, 1, 1], [], []>} : vector<64x4xbf16>, vector<4x8xbf16>, vector<64x8xf32> -> vector<64x8xf32>
    %11 = arith.addf %6, %10 : vector<64x8xf32>
    %c0_11 = arith.constant 0 : index
    %c0_12 = arith.constant 0 : index
    %c1 = arith.constant 1 : index
    %c0_13 = arith.constant 0 : index
    %12 = vector.load %arg1[%c0_11, %c0_12, %c1, %c0_13] : memref<1x9x9x4xbf16, #tpu.memory_space<vmem>>, vector<1x8x8x4xbf16>
    %13 = vector.shape_cast %12 : vector<1x8x8x4xbf16> to vector<64x4xbf16>
    %14 = vector.extract_strided_slice %0 {offsets = [8, 0], sizes = [4, 8], strides = [1, 1]} : vector<64x8xbf16> to vector<4x8xbf16>
    %cst_14 = arith.constant dense<0.000000e+00> : vector<64x8xf32>
    %15 = tpu.matmul %13, %14, %cst_14 {dimension_numbers = #tpu.dot_dimension_numbers<[1], [0], [0], [1], [0, 0, 1, 1], [], []>} : vector<64x4xbf16>, vector<4x8xbf16>, vector<64x8xf32> -> vector<64x8xf32>
    %16 = arith.addf %11, %15 : vector<64x8xf32>
    %c0_15 = arith.constant 0 : index
    %c0_16 = arith.constant 0 : index
    %c1_17 = arith.constant 1 : index
    %c0_18 = arith.constant 0 : index
    %17 = vector.load %arg2[%c0_15, %c0_16, %c1_17, %c0_18] : memref<1x9x9x4xbf16, #tpu.memory_space<vmem>>, vector<1x8x8x4xbf16>
    %18 = vector.shape_cast %17 : vector<1x8x8x4xbf16> to vector<64x4xbf16>
    %19 = vector.extract_strided_slice %0 {offsets = [12, 0], sizes = [4, 8], strides = [1, 1]} : vector<64x8xbf16> to vector<4x8xbf16>
    %cst_19 = arith.constant dense<0.000000e+00> : vector<64x8xf32>
    %20 = tpu.matmul %18, %19, %cst_19 {dimension_numbers = #tpu.dot_dimension_numbers<[1], [0], [0], [1], [0, 0, 1, 1], [], []>} : vector<64x4xbf16>, vector<4x8xbf16>, vector<64x8xf32> -> vector<64x8xf32>
    %21 = arith.addf %16, %20 : vector<64x8xf32>
    %c0_20 = arith.constant 0 : index
    %c0_21 = arith.constant 0 : index
    %c0_22 = arith.constant 0 : index
    %c0_23 = arith.constant 0 : index
    %22 = vector.load %arg3[%c0_20, %c0_21, %c0_22, %c0_23] : memref<1x9x9x4xbf16, #tpu.memory_space<vmem>>, vector<1x8x8x4xbf16>
    %23 = vector.shape_cast %22 : vector<1x8x8x4xbf16> to vector<64x4xbf16>
    %24 = vector.extract_strided_slice %0 {offsets = [16, 0], sizes = [4, 8], strides = [1, 1]} : vector<64x8xbf16> to vector<4x8xbf16>
    %cst_24 = arith.constant dense<0.000000e+00> : vector<64x8xf32>
    %25 = tpu.matmul %23, %24, %cst_24 {dimension_numbers = #tpu.dot_dimension_numbers<[1], [0], [0], [1], [0, 0, 1, 1], [], []>} : vector<64x4xbf16>, vector<4x8xbf16>, vector<64x8xf32> -> vector<64x8xf32>
    %26 = arith.addf %21, %25 : vector<64x8xf32>
    %c0_25 = arith.constant 0 : index
    %c0_26 = arith.constant 0 : index
    %c0_27 = arith.constant 0 : index
    %c0_28 = arith.constant 0 : index
    %27 = vector.load %arg4[%c0_25, %c0_26, %c0_27, %c0_28] : memref<1x9x9x4xbf16, #tpu.memory_space<vmem>>, vector<1x8x8x4xbf16>
    %28 = vector.shape_cast %27 : vector<1x8x8x4xbf16> to vector<64x4xbf16>
    %29 = vector.extract_strided_slice %0 {offsets = [20, 0], sizes = [4, 8], strides = [1, 1]} : vector<64x8xbf16> to vector<4x8xbf16>
    %cst_29 = arith.constant dense<0.000000e+00> : vector<64x8xf32>
    %30 = tpu.matmul %28, %29, %cst_29 {dimension_numbers = #tpu.dot_dimension_numbers<[1], [0], [0], [1], [0, 0, 1, 1], [], []>} : vector<64x4xbf16>, vector<4x8xbf16>, vector<64x8xf32> -> vector<64x8xf32>
    %31 = arith.addf %26, %30 : vector<64x8xf32>
    %c0_30 = arith.constant 0 : index
    %c0_31 = arith.constant 0 : index
    %c1_32 = arith.constant 1 : index
    %c0_33 = arith.constant 0 : index
    %32 = vector.load %arg3[%c0_30, %c0_31, %c1_32, %c0_33] : memref<1x9x9x4xbf16, #tpu.memory_space<vmem>>, vector<1x8x8x4xbf16>
    %33 = vector.shape_cast %32 : vector<1x8x8x4xbf16> to vector<64x4xbf16>
    %34 = vector.extract_strided_slice %0 {offsets = [24, 0], sizes = [4, 8], strides = [1, 1]} : vector<64x8xbf16> to vector<4x8xbf16>
    %cst_34 = arith.constant dense<0.000000e+00> : vector<64x8xf32>
    %35 = tpu.matmul %33, %34, %cst_34 {dimension_numbers = #tpu.dot_dimension_numbers<[1], [0], [0], [1], [0, 0, 1, 1], [], []>} : vector<64x4xbf16>, vector<4x8xbf16>, vector<64x8xf32> -> vector<64x8xf32>
    %36 = arith.addf %31, %35 : vector<64x8xf32>
    %c0_35 = arith.constant 0 : index
    %c0_36 = arith.constant 0 : index
    %c1_37 = arith.constant 1 : index
    %c0_38 = arith.constant 0 : index
    %37 = vector.load %arg4[%c0_35, %c0_36, %c1_37, %c0_38] : memref<1x9x9x4xbf16, #tpu.memory_space<vmem>>, vector<1x8x8x4xbf16>
    %38 = vector.shape_cast %37 : vector<1x8x8x4xbf16> to vector<64x4xbf16>
    %39 = vector.extract_strided_slice %0 {offsets = [28, 0], sizes = [4, 8], strides = [1, 1]} : vector<64x8xbf16> to vector<4x8xbf16>
    %cst_39 = arith.constant dense<0.000000e+00> : vector<64x8xf32>
    %40 = tpu.matmul %38, %39, %cst_39 {dimension_numbers = #tpu.dot_dimension_numbers<[1], [0], [0], [1], [0, 0, 1, 1], [], []>} : vector<64x4xbf16>, vector<4x8xbf16>, vector<64x8xf32> -> vector<64x8xf32>
    %41 = arith.addf %36, %40 : vector<64x8xf32>
    %c0_40 = arith.constant 0 : index
    %c1_41 = arith.constant 1 : index
    %c0_42 = arith.constant 0 : index
    %c0_43 = arith.constant 0 : index
    %42 = vector.load %arg1[%c0_40, %c1_41, %c0_42, %c0_43] : memref<1x9x9x4xbf16, #tpu.memory_space<vmem>>, vector<1x8x8x4xbf16>
    %43 = vector.shape_cast %42 : vector<1x8x8x4xbf16> to vector<64x4xbf16>
    %44 = vector.extract_strided_slice %0 {offsets = [32, 0], sizes = [4, 8], strides = [1, 1]} : vector<64x8xbf16> to vector<4x8xbf16>
    %cst_44 = arith.constant dense<0.000000e+00> : vector<64x8xf32>
    %45 = tpu.matmul %43, %44, %cst_44 {dimension_numbers = #tpu.dot_dimension_numbers<[1], [0], [0], [1], [0, 0, 1, 1], [], []>} : vector<64x4xbf16>, vector<4x8xbf16>, vector<64x8xf32> -> vector<64x8xf32>
    %46 = arith.addf %41, %45 : vector<64x8xf32>
    %c0_45 = arith.constant 0 : index
    %c1_46 = arith.constant 1 : index
    %c0_47 = arith.constant 0 : index
    %c0_48 = arith.constant 0 : index
    %47 = vector.load %arg2[%c0_45, %c1_46, %c0_47, %c0_48] : memref<1x9x9x4xbf16, #tpu.memory_space<vmem>>, vector<1x8x8x4xbf16>
    %48 = vector.shape_cast %47 : vector<1x8x8x4xbf16> to vector<64x4xbf16>
    %49 = vector.extract_strided_slice %0 {offsets = [36, 0], sizes = [4, 8], strides = [1, 1]} : vector<64x8xbf16> to vector<4x8xbf16>
    %cst_49 = arith.constant dense<0.000000e+00> : vector<64x8xf32>
    %50 = tpu.matmul %48, %49, %cst_49 {dimension_numbers = #tpu.dot_dimension_numbers<[1], [0], [0], [1], [0, 0, 1, 1], [], []>} : vector<64x4xbf16>, vector<4x8xbf16>, vector<64x8xf32> -> vector<64x8xf32>
    %51 = arith.addf %46, %50 : vector<64x8xf32>
    %c0_50 = arith.constant 0 : index
    %c1_51 = arith.constant 1 : index
    %c1_52 = arith.constant 1 : index
    %c0_53 = arith.constant 0 : index
    %52 = vector.load %arg1[%c0_50, %c1_51, %c1_52, %c0_53] : memref<1x9x9x4xbf16, #tpu.memory_space<vmem>>, vector<1x8x8x4xbf16>
    %53 = vector.shape_cast %52 : vector<1x8x8x4xbf16> to vector<64x4xbf16>
    %54 = vector.extract_strided_slice %0 {offsets = [40, 0], sizes = [4, 8], strides = [1, 1]} : vector<64x8xbf16> to vector<4x8xbf16>
    %cst_54 = arith.constant dense<0.000000e+00> : vector<64x8xf32>
    %55 = tpu.matmul %53, %54, %cst_54 {dimension_numbers = #tpu.dot_dimension_numbers<[1], [0], [0], [1], [0, 0, 1, 1], [], []>} : vector<64x4xbf16>, vector<4x8xbf16>, vector<64x8xf32> -> vector<64x8xf32>
    %56 = arith.addf %51, %55 : vector<64x8xf32>
    %c0_55 = arith.constant 0 : index
    %c1_56 = arith.constant 1 : index
    %c1_57 = arith.constant 1 : index
    %c0_58 = arith.constant 0 : index
    %57 = vector.load %arg2[%c0_55, %c1_56, %c1_57, %c0_58] : memref<1x9x9x4xbf16, #tpu.memory_space<vmem>>, vector<1x8x8x4xbf16>
    %58 = vector.shape_cast %57 : vector<1x8x8x4xbf16> to vector<64x4xbf16>
    %59 = vector.extract_strided_slice %0 {offsets = [44, 0], sizes = [4, 8], strides = [1, 1]} : vector<64x8xbf16> to vector<4x8xbf16>
    %cst_59 = arith.constant dense<0.000000e+00> : vector<64x8xf32>
    %60 = tpu.matmul %58, %59, %cst_59 {dimension_numbers = #tpu.dot_dimension_numbers<[1], [0], [0], [1], [0, 0, 1, 1], [], []>} : vector<64x4xbf16>, vector<4x8xbf16>, vector<64x8xf32> -> vector<64x8xf32>
    %61 = arith.addf %56, %60 : vector<64x8xf32>
    %c0_60 = arith.constant 0 : index
    %c1_61 = arith.constant 1 : index
    %c0_62 = arith.constant 0 : index
    %c0_63 = arith.constant 0 : index
    %62 = vector.load %arg3[%c0_60, %c1_61, %c0_62, %c0_63] : memref<1x9x9x4xbf16, #tpu.memory_space<vmem>>, vector<1x8x8x4xbf16>
    %63 = vector.shape_cast %62 : vector<1x8x8x4xbf16> to vector<64x4xbf16>
    %64 = vector.extract_strided_slice %0 {offsets = [48, 0], sizes = [4, 8], strides = [1, 1]} : vector<64x8xbf16> to vector<4x8xbf16>
    %cst_64 = arith.constant dense<0.000000e+00> : vector<64x8xf32>
    %65 = tpu.matmul %63, %64, %cst_64 {dimension_numbers = #tpu.dot_dimension_numbers<[1], [0], [0], [1], [0, 0, 1, 1], [], []>} : vector<64x4xbf16>, vector<4x8xbf16>, vector<64x8xf32> -> vector<64x8xf32>
    %66 = arith.addf %61, %65 : vector<64x8xf32>
    %c0_65 = arith.constant 0 : index
    %c1_66 = arith.constant 1 : index
    %c0_67 = arith.constant 0 : index
    %c0_68 = arith.constant 0 : index
    %67 = vector.load %arg4[%c0_65, %c1_66, %c0_67, %c0_68] : memref<1x9x9x4xbf16, #tpu.memory_space<vmem>>, vector<1x8x8x4xbf16>
    %68 = vector.shape_cast %67 : vector<1x8x8x4xbf16> to vector<64x4xbf16>
    %69 = vector.extract_strided_slice %0 {offsets = [52, 0], sizes = [4, 8], strides = [1, 1]} : vector<64x8xbf16> to vector<4x8xbf16>
    %cst_69 = arith.constant dense<0.000000e+00> : vector<64x8xf32>
    %70 = tpu.matmul %68, %69, %cst_69 {dimension_numbers = #tpu.dot_dimension_numbers<[1], [0], [0], [1], [0, 0, 1, 1], [], []>} : vector<64x4xbf16>, vector<4x8xbf16>, vector<64x8xf32> -> vector<64x8xf32>
    %71 = arith.addf %66, %70 : vector<64x8xf32>
    %c0_70 = arith.constant 0 : index
    %c1_71 = arith.constant 1 : index
    %c1_72 = arith.constant 1 : index
    %c0_73 = arith.constant 0 : index
    %72 = vector.load %arg3[%c0_70, %c1_71, %c1_72, %c0_73] : memref<1x9x9x4xbf16, #tpu.memory_space<vmem>>, vector<1x8x8x4xbf16>
    %73 = vector.shape_cast %72 : vector<1x8x8x4xbf16> to vector<64x4xbf16>
    %74 = vector.extract_strided_slice %0 {offsets = [56, 0], sizes = [4, 8], strides = [1, 1]} : vector<64x8xbf16> to vector<4x8xbf16>
    %cst_74 = arith.constant dense<0.000000e+00> : vector<64x8xf32>
    %75 = tpu.matmul %73, %74, %cst_74 {dimension_numbers = #tpu.dot_dimension_numbers<[1], [0], [0], [1], [0, 0, 1, 1], [], []>} : vector<64x4xbf16>, vector<4x8xbf16>, vector<64x8xf32> -> vector<64x8xf32>
    %76 = arith.addf %71, %75 : vector<64x8xf32>
    %c0_75 = arith.constant 0 : index
    %c1_76 = arith.constant 1 : index
    %c1_77 = arith.constant 1 : index
    %c0_78 = arith.constant 0 : index
    %77 = vector.load %arg4[%c0_75, %c1_76, %c1_77, %c0_78] : memref<1x9x9x4xbf16, #tpu.memory_space<vmem>>, vector<1x8x8x4xbf16>
    %78 = vector.shape_cast %77 : vector<1x8x8x4xbf16> to vector<64x4xbf16>
    %79 = vector.extract_strided_slice %0 {offsets = [60, 0], sizes = [4, 8], strides = [1, 1]} : vector<64x8xbf16> to vector<4x8xbf16>
    %cst_79 = arith.constant dense<0.000000e+00> : vector<64x8xf32>
    %80 = tpu.matmul %78, %79, %cst_79 {dimension_numbers = #tpu.dot_dimension_numbers<[1], [0], [0], [1], [0, 0, 1, 1], [], []>} : vector<64x4xbf16>, vector<4x8xbf16>, vector<64x8xf32> -> vector<64x8xf32>
    %81 = arith.addf %76, %80 : vector<64x8xf32>
    %c0_80 = arith.constant 0 : index
    %c0_81 = arith.constant 0 : index
    %82 = vector.load %arg6[%c0_80, %c0_81] : memref<1x8xf32, #tpu.memory_space<vmem>>, vector<1x8xf32>
    %83 = vector.broadcast %82 : vector<1x8xf32> to vector<64x8xf32>
    %84 = arith.addf %81, %83 : vector<64x8xf32>
    %cst_82 = arith.constant 0.000000e+00 : f32
    %85 = vector.broadcast %cst_82 : f32 to vector<64x8xf32>
    %86 = arith.maximumf %84, %85 : vector<64x8xf32>
    %87 = vector.shape_cast %86 : vector<64x8xf32> to vector<1x64x8xf32>
    %c0_83 = arith.constant 0 : index
    %c0_84 = arith.constant 0 : index
    %c0_85 = arith.constant 0 : index
    %88 = vector.load %arg7[%c0_83, %c0_84, %c0_85] : memref<1x64x8xf32, #tpu.memory_space<vmem>>, vector<1x64x8xf32>
    tpu.vector_store %arg7[%c0_83, %c0_84, %c0_85], %87 {strides = array<i32>} : memref<1x64x8xf32, #tpu.memory_space<vmem>>, vector<1x64x8xf32>,
    return
  }
  func.func @transform_0(%arg0: i32) -> (i32, i32, i32, i32) {
    %c0_i32 = arith.constant 0 : i32
    %c0_i32_0 = arith.constant 0 : i32
    %c0_i32_1 = arith.constant 0 : i32
    %c0_i32_2 = arith.constant 0 : i32
    return %arg0, %c0_i32, %c0_i32_0, %c0_i32_1 : i32, i32, i32, i32
  }
  func.func @transform_1(%arg0: i32) -> (i32, i32, i32, i32) {
    %c0_i32 = arith.constant 0 : i32
    %c0_i32_0 = arith.constant 0 : i32
    %c0_i32_1 = arith.constant 0 : i32
    %c0_i32_2 = arith.constant 0 : i32
    return %arg0, %c0_i32, %c0_i32_0, %c0_i32_1 : i32, i32, i32, i32
  }
  func.func @transform_2(%arg0: i32) -> (i32, i32, i32, i32) {
    %c0_i32 = arith.constant 0 : i32
    %c0_i32_0 = arith.constant 0 : i32
    %c0_i32_1 = arith.constant 0 : i32
    %c0_i32_2 = arith.constant 0 : i32
    return %arg0, %c0_i32, %c0_i32_0, %c0_i32_1 : i32, i32, i32, i32
  }
  func.func @transform_3(%arg0: i32) -> (i32, i32, i32, i32) {
    %c0_i32 = arith.constant 0 : i32
    %c0_i32_0 = arith.constant 0 : i32
    %c0_i32_1 = arith.constant 0 : i32
    %c0_i32_2 = arith.constant 0 : i32
    return %arg0, %c0_i32, %c0_i32_0, %c0_i32_1 : i32, i32, i32, i32
  }
  func.func @transform_4(%arg0: i32) -> (i32, i32) {
    %c0_i32 = arith.constant 0 : i32
    %c0_i32_0 = arith.constant 0 : i32
    %c0_i32_1 = arith.constant 0 : i32
    return %c0_i32, %c0_i32_0 : i32, i32
  }
  func.func @transform_5(%arg0: i32) -> (i32, i32) {
    %c0_i32 = arith.constant 0 : i32
    %c0_i32_0 = arith.constant 0 : i32
    %c0_i32_1 = arith.constant 0 : i32
    return %c0_i32, %c0_i32_0 : i32, i32
  }
  func.func @transform_6(%arg0: i32) -> (i32, i32, i32) {
    %c0_i32 = arith.constant 0 : i32
    %c0_i32_0 = arith.constant 0 : i32
    %c0_i32_1 = arith.constant 0 : i32
    return %arg0, %c0_i32, %c0_i32_0 : i32, i32, i32
  }
}

</mosaic_0001>

<bundles_post_ra>
// kernel: tpu_custom_call.1
= control target key start
LH: loop header
LB: loop body
LE: loop exit
PB: predicated region body
PF: predicated region fallthrough
CT: control target
= control target key end

     0   :  { %s3936_s21 = smov 0   ;;  %s4505_s0 = inlined_call_operand.vmem [shape: bf16[2,9,9,4], index: 0, kind: input, shape index: {}]   ;;  %s4506_s1 = inlined_call_operand.vmem [shape: bf16[2,9,9,4], index: 1, kind: input, shape index: {}]   ;;  %s4507_s2 = inlined_call_operand.vmem [shape: bf16[2,9,9,4], index: 2, kind: input, shape index: {}]   ;;  %s4508_s3 = inlined_call_operand.vmem [shape: bf16[2,9,9,4], index: 3, kind: input, shape index: {}]   ;;  %s4509_s4 = inlined_call_operand.vmem [shape: bf16[64,8], index: 4, kind: input, shape index: {}]   ;;  %s4510_s5 = inlined_call_operand.vmem [shape: f32[1,8], index: 5, kind: input, shape index: {}]   ;;  %s4511_s6 = inlined_call_operand.vmem [shape: f32[2,64,8], index: 6, kind: output, shape index: {}]  }
   0x1 LB: > { %s3221_s22 = sadd.s32 4294967295, %s3899_s21   ;;  %p3225_p0 = scmp.ge.s32.totalorder %s3899_s21, 1  ;;  %s3899_s21 = sphi %s3936_s21, %s16_s21  }
   0x2   : > { %p242_p1 = scmp.lt.s32.totalorder %s3899_s21, 3 }
   0x4   : > { %p243_p2 = pnand %p3225_p0, %p242_p1 }
   0x5   : > { %v313_v0 = vld [vmem:[%s4509_s4] sm:$0xf] (!%p243_p2)  ;;  %vm374_vm0 = vcmask (!%p243_p2), 1041408   ;;  %v317_v1 = vld [vmem:[%s4509_s4 + $0x10] sm:$0xf] (!%p243_p2)  ;;  %p287_p3 = scmp.lt.s32.totalorder (!%p243_p2), %s3221_s22, 1 }
   0x6   : > { %246 = sbr.rel (%p243_p2) target bundleno = 408 (0x198), region = 44  ;;  %v3236_v2 = vcombine.low (!%p243_p2), %v313_v0, %v313_v0  ;;  %3836 = vmatprep.subr.msk.bf16.mxu0 (!%p243_p2), %vm374_vm0, %v317_v1  ;;  %v3328_v3 = vcombine.low (!%p243_p2), %v317_v1, %v317_v1  ;;  %v1744_v4 = vsel (!%p243_p2), %vm374_vm0, %v317_v1, 0  ;;  %v314_v7 = vld [vmem:[%s4509_s4 + $0x4] sm:$0xf] (!%p243_p2)  ;;  %v318_v8 = vld [vmem:[%s4509_s4 + $0x14] sm:$0xf] (!%p243_p2) }
   0x7   : > { %3629 = vmatpush3.bf16.msra.mxu0 (!%p243_p2), %v1744_v4  ;;  %vm361_vm1 = vcmask (!%p243_p2), 31744   ;;  %v476_v10 = vsel (!%p243_p2), %vm374_vm0, %v313_v0, 0  ;;  %v3981_v12 = vsel (!%p243_p2), %vm374_vm0, %v314_v7, 0  ;;  %v3984_v13 = vsel (!%p243_p2), %vm374_vm0, %v318_v8, 0  ;;  %v4005_v24 = vld [vmem:[%s4509_s4 + $0x8] sm:$0xf] (!%p243_p2) }
   0x8   : > { %v360_v5 = vrot.slane (!%p243_p2), %v3236_v2, 2  ;;  %v1851_v6 = vrot.slane (!%p243_p2), %v3328_v3, 2  ;;  %v3261_v17 = vcombine.low (!%p243_p2), %v314_v7, %v314_v7  ;;  %v3377_v18 = vcombine.low (!%p243_p2), %v318_v8, %v318_v8 }
   0x9   : > { %v3278_v28 = vcombine.low (!%p243_p2), %v4005_v24, %v4005_v24  ;;  %vm559_vm2 = vsmask.f32 (!%p243_p2), 3328  ;;  %vm560_vm3 = vsmask.f32 (!%p243_p2), 7440  ;;  %v4023_v31 = vsel (!%p243_p2), %vm374_vm0, %v4005_v24, 0 }
   0xa   : > { %3828 = vmatprep.subr.msk.bf16.mxu1 (!%p243_p2), %vm374_vm0, %v360_v5  ;;  %v376_v9 = vsel (!%p243_p2), %vm374_vm0, %v360_v5, 0  ;;  %3837 = vmatprep.subr.msk.bf16.mxu0 (!%p243_p2), %vm374_vm0, %v1851_v6  ;;  %v1865_v11 = vsel (!%p243_p2), %vm374_vm0, %v1851_v6, 0  ;;  %v3998_v22 = vrot.slane (!%p243_p2), %v3261_v17, 2  ;;  %v4000_v23 = vrot.slane (!%p243_p2), %v3377_v18, 2  ;;  %vm4054_vm4 = vmor (!%p243_p2), %vm559_vm2, %vm560_vm3 }
   0xb   : > { %3549 = vmatpush3.bf16.msra.mxu1 (!%p243_p2), %v376_v9  ;;  %v4031_v33 = vrot.slane (!%p243_p2), %v3278_v28, 2  ;;  %vm3121_vm5 = vcmask (!%p243_p2), 64512  }
   0xc   : > { %3829 = vmatprep.subr.msk.bf16.mxu1 (!%p243_p2), %vm374_vm0, %v313_v0  ;;  %v4019_v30 = vsel (!%p243_p2), %vm374_vm0, %v3998_v22, 0  ;;  %v4029_v32 = vsel (!%p243_p2), %vm374_vm0, %v4000_v23, 0 }
   0xd   : > { %s4515_s22 = smov (!%p287_p3, %s3221_s22), 1 }
   0xe   : > { %s3961_s7 = smul.u32 72, %s4515_s22  ;;  %s3467_s8 = sshll.u32 %s4515_s22, 6 }
   0xf   : > { %s4484_s11 = scalar_lea.vmem %s4511_s6, %s3467_s8 }
  0x10   : > { %s3970_s10 = scalar_lea.vmem %s4506_s1, %s3961_s7  ;;  %s3976_s13 = scalar_lea.vmem %s4505_s0, %s3961_s7 }
  0x11   : > { %v3855_v14 = vld [vmem:[%s3970_s10] ss:$8 sps:$4 sm:$0xff]   ;;  %v3857_v16 = vld [vmem:[%s3970_s10 + $0x10] ss:$8 sps:$4 sm:$0xff]   ;;  %v544_v38 = vld [vmem:[%s3976_s13 + $0x4] sm:$0x1]  ;;  %s4167_s20 = scalar_lea.vmem %s4507_s2, %s3961_s7  ;;  %s4217_s25 = scalar_lea.vmem %s4508_s3, %s3961_s7 }
  0x12   : > { %v3856_v15 = vld [vmem:[%s3976_s13 + $0x8] ss:$8 sps:$4 sm:$0xff]   ;;  %3550 = vmatprep.mubr.msk.bf16.mxu1 %vm361_vm1, %v3855_v14  ;;  %v3858_v19 = vld [vmem:[%s3976_s13 + $0x18] ss:$8 sps:$4 sm:$0xff]   ;;  %v546_v41 = vld [vmem:[%s3976_s13 + $0xc] sm:$0x1] }
  0x13   : > { %3630 = vmatprep.mubr.msk.bf16.mxu0 %vm361_vm1, %v3856_v15  ;;  %3551 = vmatmul.mubr.msk.bf16.vlgmr.msra.gmra.mrb[0].mxu1 %vm361_vm1, %v3857_v16  ;;  %v3859_v20 = vld [vmem:[%s3970_s10 + $0x20] ss:$8 sps:$4 sm:$0xff]   ;;  %v3861_v25 = vld [vmem:[%s3970_s10 + $0x30] ss:$8 sps:$4 sm:$0xff]   ;;  %v572_v44 = vshll.u32 %v544_v38, 16  ;;  %v586_v47 = vshll.u32 %v546_v41, 16 }
  0x14   : > { %3559 = vmatpush3.bf16.msra.mxu1 %v476_v10  ;;  %3631 = vmatmul.mubr.msk.bf16.vlgmr.msra.gmra.mrb[0].mxu0 %vm361_vm1, %v3858_v19  ;;  %v3860_v21 = vld [vmem:[%s3976_s13 + $0x28] ss:$8 sps:$4 sm:$0xff]   ;;  %v3862_v26 = vld [vmem:[%s3976_s13 + $0x38] ss:$8 sps:$4 sm:$0xff]   ;;  %v3334_v49 = vld [vmem:[%s3976_s13 + $0xc] sm:$0x1] }
  0x15   : > { %3639 = vmatpush3.bf16.msra.mxu0 %v1865_v11  ;;  %3554 = vmatprep.mubr.msk.bf16.mxu1 %vm361_vm1, %v3859_v20  ;;  %v3863_v27 = vld [vmem:[%s3976_s13] ss:$8 sps:$4 sm:$0xff]   ;;  %v3867_v34 = vld [vmem:[%s3976_s13 + $0x10] ss:$8 sps:$4 sm:$0xff]   ;;  %v574_v52 = vrot.slane %v572_v44, 5  ;;  %v588_v56 = vrot.slane %v586_v47, 5 }
  0x16   : > { %3634 = vmatprep.mubr.msk.bf16.mxu0 %vm361_vm1, %v3860_v21  ;;  %3830 = vmatprep.subr.msk.bf16.mxu1 %vm374_vm0, %v314_v7  ;;  %v3865_v29 = vld [vmem:[%s3970_s10 + $0x8] ss:$8 sps:$4 sm:$0xff]   ;;  %v3868_v35 = vld [vmem:[%s3970_s10 + $0x18] ss:$8 sps:$4 sm:$0xff]   ;;  %v3336_v57 = vld [vmem:[%s3976_s13 + $0x14] sm:$0x1] }
  0x17   : > { %3838 = vmatprep.subr.msk.bf16.mxu0 %vm374_vm0, %v318_v8  ;;  %v3869_v36 = vld [vmem:[%s3976_s13 + $0x20] ss:$8 sps:$4 sm:$0xff]   ;;  %v3335_v54 = vld [vmem:[%s3976_s13 + $0x10] sm:$0xf]  ;;  %v1966_v61 = vshll.u32 %v3334_v49, 16  ;;  %v1980_v5 = vshll.u32 %v3336_v57, 16 }
  0x18   : > { %v543_v37 = vld [vmem:[%s3976_s13] sm:$0xf]  ;;  %v545_v39 = vld [vmem:[%s3976_s13 + $0x8] sm:$0xf]  ;;  %v1971_v62 = vshrl.u32 %v3335_v54, 16  ;;  %v1974_v63 = vshll.u32 %v3335_v54, 16 }
  0x19   : > { %v3870_v40 = vld [vmem:[%s3970_s10 + $0x28] ss:$8 sps:$4 sm:$0xff]   ;;  %v563_v42 = vshrl.u32 %v543_v37, 16  ;;  %v566_v43 = vshll.u32 %v543_v37, 16  ;;  %v577_v45 = vshrl.u32 %v545_v39, 16  ;;  %v580_v46 = vshll.u32 %v545_v39, 16 }
  0x1a   : > { %v3333_v48 = vld [vmem:[%s3976_s13 + $0x8] sm:$0xf]  ;;  %v547_v0 = vld [vmem:[%s3976_s13 + $0x10] sm:$0xf]  ;;  %v548_v6 = vld [vmem:[%s3976_s13 + $0x14] sm:$0x1] }
  0x1b   : > { %3555 = vmatmul.mubr.msk.bf16.gmra.mrb[4].mxu1 %vm361_vm1, %v3861_v25  ;;  %v565_v50 = vrot.slane %v563_v42, 4  ;;  %v568_v51 = vrot.slane %v566_v43, 5  ;;  %v579_v53 = vrot.slane %v577_v45, 4  ;;  %v582_v55 = vrot.slane %v580_v46, 5  ;;  %v549_v11 = vld [vmem:[%s3976_s13 + $0x18] sm:$0xf] }
  0x1c   : > { %3635 = vmatmul.mubr.msk.bf16.gmra.mrb[4].mxu0 %vm361_vm1, %v3862_v26  ;;  %3560 = vmatprep.mubr.msk.bf16.mxu1 %vm361_vm1, %v3863_v27  ;;  %v1957_v58 = vshrl.u32 %v3333_v48, 16  ;;  %v1960_v59 = vshll.u32 %v3333_v48, 16  ;;  %v1968_v8 = vrot.slane %v1966_v61, 5  ;;  %v1973_v9 = vrot.slane %v1971_v62, 4  ;;  %v3872_v17 = vld [vmem:[%s3970_s10 + $0x38] ss:$8 sps:$4 sm:$0xff]  }
  0x1d   : > { %3640 = vmatprep.mubr.msk.bf16.mxu0 %vm361_vm1, %v3865_v29  ;;  %v569_v60 = vor.u32 %v568_v51, %v565_v50  ;;  %v583_v2 = vor.u32 %v582_v55, %v579_v53  ;;  %v1976_v10 = vrot.slane %v1974_v63, 5  ;;  %v1982_v15 = vrot.slane %v1980_v5, 5  ;;  %v550_v20 = vld [vmem:[%s3976_s13 + $0x1c] sm:$0x1]  ;;  %v3337_v29 = vld [vmem:[%s3976_s13 + $0x18] sm:$0xf] }
  0x1e   : > { %v1959_v3 = vrot.slane %v1957_v58, 4  ;;  %v1962_v4 = vrot.slane %v1960_v59, 5  ;;  %v591_v16 = vshrl.u32 %v547_v0, 16  ;;  %v594_v21 = vshll.u32 %v547_v0, 16  ;;  %v3338_v37 = vld [vmem:[%s3976_s13 + $0x1c] sm:$0x1] }
  0x1f   : > { %v570_v7 = vrot.slane %v569_v60, 4  ;;  %v1977_v19 = vor.u32 %v1976_v10, %v1973_v9  ;;  %v605_v28 = vshrl.u32 %v549_v11, 16  ;;  %v614_v41 = vshll.u32 %v550_v20, 16  ;;  %v3339_v42 = vld [vmem:[%s3976_s13 + $0x20] sm:$0xf] }
  0x20   : > { %v1963_v14 = vor.u32 %v1962_v4, %v1959_v3  ;;  %v593_v27 = vrot.slane %v591_v16, 4  ;;  %v3340_v45 = vld [vmem:[%s3976_s13 + $0x24] sm:$0x1]  ;;  %v1985_v46 = vshrl.u32 %v3337_v29, 16  ;;  %v1988_v47 = vshll.u32 %v3337_v29, 16 }
  0x21   : > { %v575_v18 = vsel %vm4054_vm4, %v570_v7, %v574_v52  ;;  %v607_v39 = vrot.slane %v605_v28, 4  ;;  %v616_v50 = vrot.slane %v614_v41, 5  ;;  %v1994_v51 = vshll.u32 %v3338_v37, 16  ;;  %v551_v52 = vld [vmem:[%s3976_s13 + $0x20] sm:$0xf] }
  0x22   : > { %v1964_v26 = vrot.slane %v1963_v14, 4  ;;  %v1987_v54 = vrot.slane %v1985_v46, 4  ;;  %v1990_v55 = vrot.slane %v1988_v47, 5  ;;  %v552_v57 = vld [vmem:[%s3976_s13 + $0x24] sm:$0x1]  ;;  %v2002_v60 = vshll.u32 %v3339_v42, 16 }
  0x23   : > { %3561 = vmatmul.mubr.msk.bf16.vlgmr.msra.gmra.mrb[0].mxu1 %vm361_vm1, %v3867_v34  ;;  %v1978_v34 = vrot.slane %v1977_v19, 4  ;;  %v1996_v59 = vrot.slane %v1994_v51, 5  ;;  %v2008_v61 = vshll.u32 %v3340_v45, 16  ;;  %v553_v62 = vld [vmem:[%s3976_s13 + $0x28] sm:$0xf]  ;;  %v619_v3 = vshrl.u32 %v551_v52, 16 }
  0x24   : > { %3569 = vmatpush3.bf16.msra.mxu1 %v3981_v12  ;;  %3641 = vmatmul.mubr.msk.bf16.vlgmr.msra.gmra.mrb[0].mxu0 %vm361_vm1, %v3868_v35  ;;  %v3871_v12 = vld [vmem:[%s3976_s13 + $0x30] ss:$8 sps:$4 sm:$0xff]   ;;  %v596_v35 = vrot.slane %v594_v21, 5  ;;  %v1969_v38 = vsel %vm4054_vm4, %v1964_v26, %v1968_v8  ;;  %v1991_v0 = vor.u32 %v1990_v55, %v1987_v54  ;;  %v2004_v5 = vrot.slane %v2002_v60, 5  ;;  %v554_v7 = vld [vmem:[%s3976_s13 + $0x2c] sm:$0x1] }
  0x25   : > { %3649 = vmatpush3.bf16.msra.mxu0 %v3984_v13  ;;  %3564 = vmatprep.mubr.msk.bf16.mxu1 %vm361_vm1, %v3869_v36  ;;  %v584_v13 = vrot.slane %v583_v2, 4  ;;  %v1983_v43 = vsel %vm4054_vm4, %v1978_v34, %v1982_v15  ;;  %v622_v8 = vshll.u32 %v551_v52, 16  ;;  %v621_v10 = vrot.slane %v619_v3, 4  ;;  %v3343_v19 = vld [vmem:[%s3976_s13 + $0x30] sm:$0xf] }
  0x26   : > { %3644 = vmatprep.mubr.msk.bf16.mxu0 %vm361_vm1, %v3870_v40  ;;  %3831 = vmatprep.subr.msk.bf16.mxu1 %vm374_vm0, %v3998_v22  ;;  %v600_v22 = vshll.u32 %v548_v6, 16  ;;  %v608_v40 = vshll.u32 %v549_v11, 16  ;;  %v597_v44 = vor.u32 %v596_v35, %v593_v27  ;;  %v3349_v48 = vcombine.low %v1969_v38, %v1983_v43  ;;  %v556_v43 = vld [vmem:[%s3976_s13 + $0x34] sm:$0x1]  ;;  %v4112_v52 = vld [vmem:[%s4509_s4 + $0x18] sm:$0xf] }
  0x27   : > { %3839 = vmatprep.subr.msk.bf16.mxu0 %vm374_vm0, %v4000_v23  ;;  %v589_v25 = vsel %vm4054_vm4, %v584_v13, %v588_v56  ;;  %v1999_v56 = vshrl.u32 %v3339_v42, 16  ;;  %v2010_v6 = vrot.slane %v2008_v61, 5  ;;  %v1992_v9 = vrot.slane %v1991_v0, 4  ;;  %v3341_v13 = vld [vmem:[%s3976_s13 + $0x28] sm:$0xf] }
  0x28   : > { %v3249_v23 = vcombine.low %v575_v18, %v589_v25  ;;  %v602_v36 = vrot.slane %v600_v22, 5  ;;  %v610_v49 = vrot.slane %v608_v40, 5  ;;  %v598_v53 = vrot.slane %v597_v44, 4  ;;  %v3342_v18 = vld [vmem:[%s3976_s13 + $0x2c] sm:$0x1] }
  0x29   : > { %v2001_v2 = vrot.slane %v1999_v56, 4  ;;  %v628_v11 = vshll.u32 %v552_v57, 16  ;;  %v624_v16 = vrot.slane %v622_v8, 5  ;;  %v1997_v21 = vsel %vm4054_vm4, %v1992_v9, %v1996_v59  ;;  %v555_v42 = vld [vmem:[%s3976_s13 + $0x30] sm:$0xf] }
  0x2a   : > { %v611_v58 = vor.u32 %v610_v49, %v607_v39  ;;  %v603_v63 = vsel %vm4054_vm4, %v598_v53, %v602_v36  ;;  %v642_v29 = vshll.u32 %v554_v7, 16  ;;  %v2013_v34 = vshrl.u32 %v3341_v13, 16  ;;  %v558_v55 = vld [vmem:[%s3976_s13 + $0x3c] sm:$0x1]  ;;  %v3345_v61 = vld [vmem:[%s3976_s13 + $0x38] sm:$0xf] }
  0x2b   : > { %3565 = vmatmul.mubr.msk.bf16.gmra.mrb[4].mxu1 %vm361_vm1, %v3871_v12  ;;  %v633_v12 = vshrl.u32 %v553_v62, 16  ;;  %v2005_v15 = vor.u32 %v2004_v5, %v2001_v2  ;;  %v630_v22 = vrot.slane %v628_v11, 5  ;;  %v625_v27 = vor.u32 %v624_v16, %v621_v10  ;;  %v3346_v3 = vld [vmem:[%s3976_s13 + $0x3c] sm:$0x1]  ;;  %v3347_v7 = vld [vmem:[%s3976_s13 + $0x40] sm:$0xf] }
  0x2c   : > { %3645 = vmatmul.mubr.msk.bf16.gmra.mrb[4].mxu0 %vm361_vm1, %v3872_v17  ;;  %3570 = vmatprep.mubr.msk.bf16.mxu1 %vm361_vm1, %v3249_v23  ;;  %v612_v4 = vrot.slane %v611_v58, 4  ;;  %v636_v17 = vshll.u32 %v553_v62, 16  ;;  %v3344_v23 = vld [vmem:[%s3976_s13 + $0x34] sm:$0x1]  ;;  %v2016_v35 = vshll.u32 %v3341_v13, 16  ;;  %v2022_v36 = vshll.u32 %v3342_v18, 16 }
  0x2d   : > { %3650 = vmatprep.mubr.msk.bf16.mxu0 %vm361_vm1, %v3349_v48  ;;  %v635_v25 = vrot.slane %v633_v12, 4  ;;  %v2006_v26 = vrot.slane %v2005_v15, 4  ;;  %v2027_v37 = vshrl.u32 %v3343_v19, 16  ;;  %v626_v39 = vrot.slane %v625_v27, 4  ;;  %v557_v48 = vld [vmem:[%s3976_s13 + $0x38] sm:$0xf] }
  0x2e   : > { %v617_v14 = vsel %vm4054_vm4, %v612_v4, %v616_v50  ;;  %v638_v28 = vrot.slane %v636_v17, 5  ;;  %v644_v41 = vrot.slane %v642_v29, 5  ;;  %v2015_v45 = vrot.slane %v2013_v34, 4 }
  0x2f   : > { %v3250_v20 = vcombine.low %v603_v63, %v617_v14  ;;  %v2011_v38 = vsel %vm4054_vm4, %v2006_v26, %v2010_v6  ;;  %v2018_v46 = vrot.slane %v2016_v35, 5  ;;  %v2024_v47 = vrot.slane %v2022_v36, 5  ;;  %v3348_v14 = vld [vmem:[%s3976_s13 + $0x44] sm:$0x1]  ;;  %v776_v36 = vld [vmem:[%s3970_s10 + $0x8] sm:$0xf] }
  0x30   : > { %v639_v40 = vor.u32 %v638_v28, %v635_v25  ;;  %v3350_v44 = vcombine.low %v1997_v21, %v2011_v38  ;;  %v2029_v50 = vrot.slane %v2027_v37, 4  ;;  %v2030_v51 = vshll.u32 %v3343_v19, 16  ;;  %v774_v21 = vld [vmem:[%s3970_s10] sm:$0xf]  ;;  %v775_v28 = vld [vmem:[%s3970_s10 + $0x4] sm:$0x1] }
  0x31   : > { %v2019_v53 = vor.u32 %v2018_v46, %v2015_v45  ;;  %v2036_v54 = vshll.u32 %v3344_v23, 16  ;;  %v647_v56 = vshrl.u32 %v555_v42, 16  ;;  %v656_v59 = vshll.u32 %v556_v43, 16  ;;  %v777_v43 = vld [vmem:[%s3970_s10 + $0xc] sm:$0x1] }
  0x32   : > { %v640_v49 = vrot.slane %v639_v40, 4  ;;  %v2032_v58 = vrot.slane %v2030_v51, 5  ;;  %v661_v60 = vshrl.u32 %v557_v48, 16  ;;  %v664_v9 = vshll.u32 %v557_v48, 16 }
  0x33   : > { %3571 = vmatmul.mubr.msk.bf16.vlgmr.msra.gmra.mrb[0].mxu1 %vm361_vm1, %v3250_v20  ;;  %v2020_v63 = vrot.slane %v2019_v53, 4  ;;  %v2038_v0 = vrot.slane %v2036_v54, 5  ;;  %v649_v2 = vrot.slane %v647_v56, 4  ;;  %v670_v10 = vshll.u32 %v558_v55, 16  ;;  %v3358_v55 = vld [vmem:[%s3970_s10 + $0xc] sm:$0x1] }
  0x34   : > { %3579 = vmatpush3.bf16.msra.mxu1 %v4019_v30  ;;  %v631_v30 = vsel %vm4054_vm4, %v626_v39, %v630_v22  ;;  %3651 = vmatmul.mubr.msk.bf16.vlgmr.msra.gmra.mrb[0].mxu0 %vm361_vm1, %v3350_v44  ;;  %v645_v57 = vsel %vm4054_vm4, %v640_v49, %v644_v41  ;;  %v2033_v4 = vor.u32 %v2032_v58, %v2029_v50  ;;  %v663_v6 = vrot.slane %v661_v60, 4  ;;  %v3357_v49 = vld [vmem:[%s3970_s10 + $0x8] sm:$0xf]  ;;  %v3359_v56 = vld [vmem:[%s3970_s10 + $0x10] sm:$0xf] }
  0x35   : > { %3832 = vmatprep.subr.msk.bf16.mxu1 %vm374_vm0, %v4005_v24  ;;  %v650_v24 = vshll.u32 %v555_v42, 16  ;;  %3659 = vmatpush3.bf16.msra.mxu0 %v4029_v32  ;;  %v3251_v62 = vcombine.low %v631_v30, %v645_v57  ;;  %v658_v32 = vrot.slane %v656_v59, 5  ;;  %v2025_v8 = vsel %vm4054_vm4, %v2020_v63, %v2024_v47 }
  0x36   : > { %3840 = vmatprep.subr.msk.bf16.mxu0 %vm374_vm0, %v4112_v52  ;;  %v2041_v11 = vshrl.u32 %v3345_v61, 16  ;;  %v2034_v12 = vrot.slane %v2033_v4, 4  ;;  %v2044_v15 = vshll.u32 %v3345_v61, 16  ;;  %v2050_v16 = vshll.u32 %v3346_v3, 16 }
  0x37   : > { %v652_v5 = vrot.slane %v650_v24, 5  ;;  %3574 = vmatprep.mubr.msk.bf16.mxu1 %vm361_vm1, %v3251_v62  ;;  %v666_v17 = vrot.slane %v664_v9, 5  ;;  %v672_v18 = vrot.slane %v670_v10, 5  ;;  %v2055_v20 = vshrl.u32 %v3347_v7, 16  ;;  %v778_v9 = vld [vmem:[%s3970_s10 + $0x10] sm:$0xf] }
  0x38   : > { %v2043_v19 = vrot.slane %v2041_v11, 4  ;;  %v2039_v22 = vsel %vm4054_vm4, %v2034_v12, %v2038_v0  ;;  %v2046_v26 = vrot.slane %v2044_v15, 5  ;;  %v2052_v27 = vrot.slane %v2050_v16, 5 }
  0x39   : > { %v653_v13 = vor.u32 %v652_v5, %v649_v2  ;;  %v3351_v29 = vcombine.low %v2025_v8, %v2039_v22  ;;  %v667_v23 = vor.u32 %v666_v17, %v663_v6  ;;  %v2057_v34 = vrot.slane %v2055_v20, 4  ;;  %v3360_v2 = vld [vmem:[%s3970_s10 + $0x14] sm:$0x1] }
  0x3a   : > { %v2058_v35 = vshll.u32 %v3347_v7, 16  ;;  %v2047_v38 = vor.u32 %v2046_v26, %v2043_v19  ;;  %v2064_v39 = vshll.u32 %v3348_v14, 16  ;;  %v791_v40 = vshrl.u32 %v774_v21, 16  ;;  %v779_v14 = vld [vmem:[%s3970_s10 + $0x14] sm:$0x1] }
  0x3b   : > { %v654_v25 = vrot.slane %v653_v13, 4  ;;  %3654 = vmatprep.mubr.msk.bf16.mxu0 %vm361_vm1, %v3351_v29  ;;  %v668_v41 = vrot.slane %v667_v23, 4  ;;  %v794_v44 = vshll.u32 %v774_v21, 16  ;;  %v800_v45 = vshll.u32 %v775_v28, 16  ;;  %v780_v19 = vld [vmem:[%s3970_s10 + $0x18] sm:$0xf] }
  0x3c   : > { %v2060_v42 = vrot.slane %v2058_v35, 5  ;;  %v2048_v46 = vrot.slane %v2047_v38, 4  ;;  %v2066_v47 = vrot.slane %v2064_v39, 5  ;;  %v793_v48 = vrot.slane %v791_v40, 4  ;;  %v3362_v39 = vld [vmem:[%s3970_s10 + $0x1c] sm:$0x1] }
  0x3d   : > { %v659_v37 = vsel %vm4054_vm4, %v654_v25, %v658_v32  ;;  %v805_v30 = vshrl.u32 %v776_v36, 16  ;;  %v673_v50 = vsel %vm4054_vm4, %v668_v41, %v672_v18  ;;  %v796_v53 = vrot.slane %v794_v44, 5  ;;  %v781_v25 = vld [vmem:[%s3970_s10 + $0x1c] sm:$0x1]  ;;  %v3363_v44 = vld [vmem:[%s3970_s10 + $0x20] sm:$0xf] }
  0x3e   : > { %v2061_v51 = vor.u32 %v2060_v42, %v2057_v34  ;;  %v802_v54 = vrot.slane %v800_v45, 5  ;;  %v3252_v24 = vcombine.low %v659_v37, %v673_v50  ;;  %v2053_v57 = vsel %vm4054_vm4, %v2048_v46, %v2052_v27  ;;  %v3361_v34 = vld [vmem:[%s3970_s10 + $0x18] sm:$0xf] }
  0x3f   : > { %v807_v58 = vrot.slane %v805_v30, 4  ;;  %v808_v59 = vshll.u32 %v776_v36, 16  ;;  %v797_v61 = vor.u32 %v796_v53, %v793_v48  ;;  %v814_v62 = vshll.u32 %v777_v43, 16  ;;  %v3364_v30 = vld [vmem:[%s3970_s10 + $0x24] sm:$0x1] }
  0x40   : > { %v2062_v60 = vrot.slane %v2061_v51, 4  ;;  %v2185_v63 = vshrl.u32 %v3357_v49, 16  ;;  %3575 = vmatmul.mubr.msk.bf16.gmra.mrb[4].mxu1 %vm361_vm1, %v3252_v24  ;;  %v2188_v3 = vshll.u32 %v3357_v49, 16  ;;  %v2194_v4 = vshll.u32 %v3358_v55, 16 }
  0x41   : > { %v810_v0 = vrot.slane %v808_v59, 5  ;;  %v2199_v5 = vshrl.u32 %v3359_v56, 16  ;;  %v798_v6 = vrot.slane %v797_v61, 4  ;;  %v3410_v8 = vcombine.low %v4112_v52, %v4112_v52 }
  0x42   : > { %v2067_v32 = vsel %vm4054_vm4, %v2062_v60, %v2066_v47  ;;  %v2187_v7 = vrot.slane %v2185_v63, 4  ;;  %v816_v12 = vrot.slane %v814_v62, 5  ;;  %v2190_v13 = vrot.slane %v2188_v3, 5 }
  0x43   : > { %v3352_v10 = vcombine.low %v2053_v57, %v2067_v32  ;;  %v811_v11 = vor.u32 %v810_v0, %v807_v58  ;;  %v2196_v15 = vrot.slane %v2194_v4, 5  ;;  %v2201_v16 = vrot.slane %v2199_v5, 4  ;;  %v783_v58 = vld [vmem:[%s3970_s10 + $0x24] sm:$0x1]  ;;  %v784_v4 = vld [vmem:[%s3970_s10 + $0x28] sm:$0xf] }
  0x44   : > { %v2202_v17 = vshll.u32 %v3359_v56, 16  ;;  %v2208_v18 = vshll.u32 %v3360_v2, 16  ;;  %v803_v20 = vsel %vm4054_vm4, %v798_v6, %v802_v54  ;;  %v2191_v22 = vor.u32 %v2190_v13, %v2187_v7  ;;  %v782_v54 = vld [vmem:[%s3970_s10 + $0x20] sm:$0xf]  ;;  %v3365_v13 = vld [vmem:[%s3970_s10 + $0x28] sm:$0xf] }
  0x45   : > { %3655 = vmatmul.mubr.msk.bf16.gmra.mrb[4].mxu0 %vm361_vm1, %v3352_v10  ;;  %v812_v21 = vrot.slane %v811_v11, 4  ;;  %v819_v26 = vshrl.u32 %v778_v9, 16  ;;  %v4157_v28 = vrot.slane %v3410_v8, 2  ;;  %v822_v29 = vshll.u32 %v778_v9, 16  ;;  %v785_v8 = vld [vmem:[%s3970_s10 + $0x2c] sm:$0x1] }
  0x46   : > { %v2204_v27 = vrot.slane %v2202_v17, 5  ;;  %v828_v23 = vshll.u32 %v779_v14, 16  ;;  %v2192_v36 = vrot.slane %v2191_v22, 4  ;;  %v833_v38 = vshrl.u32 %v780_v19, 16 }
  0x47   : > { %v817_v35 = vsel %vm4054_vm4, %v812_v21, %v816_v12  ;;  %v821_v37 = vrot.slane %v819_v26, 4  ;;  %v2210_v42 = vrot.slane %v2208_v18, 5  ;;  %v824_v43 = vrot.slane %v822_v29, 5  ;;  %v3366_v18 = vld [vmem:[%s3970_s10 + $0x2c] sm:$0x1] }
  0x48   : > { %v3257_v40 = vcombine.low %v803_v20, %v817_v35  ;;  %v2205_v41 = vor.u32 %v2204_v27, %v2201_v16  ;;  %v2197_v45 = vsel %vm4054_vm4, %v2192_v36, %v2196_v15  ;;  %v835_v46 = vrot.slane %v833_v38, 4  ;;  %v786_v38 = vld [vmem:[%s3970_s10 + $0x30] sm:$0xf] }
  0x49   : > { %v836_v47 = vshll.u32 %v780_v19, 16  ;;  %v842_v48 = vshll.u32 %v781_v25, 16  ;;  %v825_v50 = vor.u32 %v824_v43, %v821_v37  ;;  %v2213_v51 = vshrl.u32 %v3361_v34, 16  ;;  %v3367_v25 = vld [vmem:[%s3970_s10 + $0x30] sm:$0xf] }
  0x4a   : > { %3580 = vmatprep.mubr.msk.bf16.mxu1 %vm361_vm1, %v3257_v40  ;;  %v2206_v49 = vrot.slane %v2205_v41, 4  ;;  %v2216_v53 = vshll.u32 %v3361_v34, 16  ;;  %v830_v55 = vrot.slane %v828_v23, 5  ;;  %v2222_v24 = vshll.u32 %v3362_v39, 16  ;;  %v3368_v37 = vld [vmem:[%s3970_s10 + $0x34] sm:$0x1] }
  0x4b   : > { %v838_v56 = vrot.slane %v836_v47, 5  ;;  %v2227_v57 = vshrl.u32 %v3363_v44, 16  ;;  %v826_v60 = vrot.slane %v825_v50, 4  ;;  %v2215_v61 = vrot.slane %v2213_v51, 4  ;;  %v787_v43 = vld [vmem:[%s3970_s10 + $0x34] sm:$0x1] }
  0x4c   : > { %v2211_v59 = vsel %vm4054_vm4, %v2206_v49, %v2210_v42  ;;  %v2218_v62 = vrot.slane %v2216_v53, 5  ;;  %v844_v2 = vrot.slane %v842_v48, 5  ;;  %v2224_v3 = vrot.slane %v2222_v24, 5  ;;  %v788_v51 = vld [vmem:[%s3970_s10 + $0x38] sm:$0xf] }
  0x4d   : > { %v3373_v63 = vcombine.low %v2197_v45, %v2211_v59  ;;  %v839_v0 = vor.u32 %v838_v56, %v835_v46  ;;  %v2229_v32 = vrot.slane %v2227_v57, 4  ;;  %v2230_v6 = vshll.u32 %v3363_v44, 16 }
  0x4e   : > { %v2219_v5 = vor.u32 %v2218_v62, %v2215_v61  ;;  %v2236_v7 = vshll.u32 %v3364_v30, 16  ;;  %v831_v9 = vsel %vm4054_vm4, %v826_v60, %v830_v55  ;;  %v847_v11 = vshrl.u32 %v782_v54, 16  ;;  %v3369_v60 = vld [vmem:[%s3970_s10 + $0x38] sm:$0xf] }
  0x4f   : > { %3660 = vmatprep.mubr.msk.bf16.mxu0 %vm361_vm1, %v3373_v63  ;;  %v840_v10 = vrot.slane %v839_v0, 4  ;;  %v850_v12 = vshll.u32 %v782_v54, 16  ;;  %v2232_v15 = vrot.slane %v2230_v6, 5  ;;  %v2442_v16 = vsel %vm374_vm0, %v4112_v52, 0 }
  0x50   : > { %v2220_v14 = vrot.slane %v2219_v5, 4  ;;  %v856_v17 = vshll.u32 %v783_v58, 16  ;;  %v849_v20 = vrot.slane %v847_v11, 4  ;;  %v861_v22 = vshrl.u32 %v784_v4, 16  ;;  %v789_v58 = vld [vmem:[%s3970_s10 + $0x3c] sm:$0x1] }
  0x51   : > { %v845_v19 = vsel %vm4054_vm4, %v840_v10, %v844_v2  ;;  %v852_v21 = vrot.slane %v850_v12, 5  ;;  %v2233_v27 = vor.u32 %v2232_v15, %v2229_v32  ;;  %v2238_v29 = vrot.slane %v2236_v7, 5  ;;  %v3370_v32 = vld [vmem:[%s3970_s10 + $0x3c] sm:$0x1]  ;;  %v3371_v10 = vld [vmem:[%s3970_s10 + $0x40] sm:$0xf] }
  0x52   : > { %v3258_v26 = vcombine.low %v831_v9, %v845_v19  ;;  %v858_v23 = vrot.slane %v856_v17, 5  ;;  %v863_v35 = vrot.slane %v861_v22, 4  ;;  %v864_v36 = vshll.u32 %v784_v4, 16  ;;  %v3372_v17 = vld [vmem:[%s3970_s10 + $0x44] sm:$0x1] }
  0x53   : > { %v853_v34 = vor.u32 %v852_v21, %v849_v20  ;;  %v870_v52 = vshll.u32 %v785_v8, 16  ;;  %v2225_v39 = vsel %vm4054_vm4, %v2220_v14, %v2224_v3  ;;  %v2234_v40 = vrot.slane %v2233_v27, 4  ;;  %v4223_v20 = vld [vmem:[%s4509_s4 + $0xc] sm:$0xf] }
  0x54   : > { %3581 = vmatmul.mubr.msk.bf16.vlgmr.msra.gmra.mrb[0].mxu1 %vm361_vm1, %v3258_v26  ;;  %v2241_v41 = vshrl.u32 %v3365_v13, 16  ;;  %v2244_v42 = vshll.u32 %v3365_v13, 16  ;;  %v866_v45 = vrot.slane %v864_v36, 5  ;;  %v2250_v46 = vshll.u32 %v3366_v18, 16 }
  0x55   : > { %3589 = vmatpush3.bf16.msra.mxu1 %v4023_v31  ;;  %v854_v44 = vrot.slane %v853_v34, 4  ;;  %v2255_v47 = vshrl.u32 %v3367_v25, 16  ;;  %v2239_v48 = vsel %vm4054_vm4, %v2234_v40, %v2238_v29  ;;  %v872_v30 = vrot.slane %v870_v52, 5 }
  0x56   : > { %v2243_v49 = vrot.slane %v2241_v41, 4  ;;  %v2246_v50 = vrot.slane %v2244_v42, 5  ;;  %3833 = vmatprep.subr.msk.bf16.mxu1 %vm374_vm0, %v4031_v33  ;;  %v3374_v53 = vcombine.low %v2225_v39, %v2239_v48  ;;  %v867_v54 = vor.u32 %v866_v45, %v863_v35  ;;  %v4237_v45 = vld [vmem:[%s4509_s4 + $0x1c] sm:$0xf] }
  0x57   : > { %v859_v31 = vsel %vm4054_vm4, %v854_v44, %v858_v23  ;;  %v2257_v55 = vrot.slane %v2255_v47, 4  ;;  %v2258_v24 = vshll.u32 %v3367_v25, 16  ;;  %v2264_v57 = vshll.u32 %v3368_v37, 16 }
  0x58   : > { %v2247_v56 = vor.u32 %v2246_v50, %v2243_v49  ;;  %v875_v59 = vshrl.u32 %v786_v38, 16  ;;  %3661 = vmatmul.mubr.msk.bf16.vlgmr.msra.gmra.mrb[0].mxu0 %vm361_vm1, %v3374_v53  ;;  %v868_v61 = vrot.slane %v867_v54, 4  ;;  %v878_v62 = vshll.u32 %v786_v38, 16  ;;  %v3875_v50 = vld [vmem:[%s4167_s20] ss:$8 sps:$4 sm:$0xff]  }
  0x59   : > { %v884_v63 = vshll.u32 %v787_v43, 16  ;;  %v889_v0 = vshrl.u32 %v788_v51, 16  ;;  %3669 = vmatpush3.bf16.msra.mxu0 %v2442_v16  ;;  %v2252_v3 = vrot.slane %v2250_v46, 5  ;;  %v2260_v4 = vrot.slane %v2258_v24, 5 }
  0x5a   : > { %v2248_v2 = vrot.slane %v2247_v56, 4  ;;  %v877_v5 = vrot.slane %v875_v59, 4  ;;  %v873_v6 = vsel %vm4054_vm4, %v868_v61, %v872_v30  ;;  %v2266_v7 = vrot.slane %v2264_v57, 5  ;;  %3841 = vmatprep.subr.msk.bf16.mxu0 %vm374_vm0, %v4157_v28  ;;  %v3876_v57 = vld [vmem:[%s4167_s20 + $0x8] ss:$8 sps:$4 sm:$0xff]  }
  0x5b   : > { %v880_v8 = vrot.slane %v878_v62, 5  ;;  %v886_v9 = vrot.slane %v884_v63, 5  ;;  %v3259_v11 = vcombine.low %v859_v31, %v873_v6  ;;  %v2261_v12 = vor.u32 %v2260_v4, %v2257_v55  ;;  %v3877_v63 = vld [vmem:[%s4167_s20 + $0x10] ss:$8 sps:$4 sm:$0xff]   ;;  %v1243_v4 = vld [vmem:[%s4167_s20 + $0x4] sm:$0x1] }
  0x5c   : > { %v891_v13 = vrot.slane %v889_v0, 4  ;;  %v892_v14 = vshll.u32 %v788_v51, 16  ;;  %v898_v16 = vshll.u32 %v789_v58, 16  ;;  %v2269_v18 = vshrl.u32 %v3369_v60, 16 }
  0x5d   : > { %v881_v15 = vor.u32 %v880_v8, %v877_v5  ;;  %v2272_v19 = vshll.u32 %v3369_v60, 16  ;;  %3584 = vmatprep.mubr.msk.bf16.mxu1 %vm361_vm1, %v3259_v11  ;;  %v2253_v21 = vsel %vm4054_vm4, %v2248_v2, %v2252_v3  ;;  %v2262_v22 = vrot.slane %v2261_v12, 4  ;;  %v3879_v2 = vld [vmem:[%s4167_s20 + $0x20] ss:$8 sps:$4 sm:$0xff]  }
  0x5e   : > { %v894_v25 = vrot.slane %v892_v14, 5  ;;  %v2283_v26 = vshrl.u32 %v3371_v10, 16  ;;  %v2271_v29 = vrot.slane %v2269_v18, 4  ;;  %v2278_v34 = vshll.u32 %v3370_v32, 16  ;;  %v1242_v3 = vld [vmem:[%s4167_s20] sm:$0xf] }
  0x5f   : > { %v882_v27 = vrot.slane %v881_v15, 4  ;;  %v2274_v23 = vrot.slane %v2272_v19, 5  ;;  %v2267_v35 = vsel %vm4054_vm4, %v2262_v22, %v2266_v7  ;;  %v900_v52 = vrot.slane %v898_v16, 5  ;;  %v1244_v5 = vld [vmem:[%s4167_s20 + $0x8] sm:$0xf] }
  0x60   : > { %v895_v36 = vor.u32 %v894_v25, %v891_v13  ;;  %v3295_v37 = vcombine.low %v4223_v20, %v4223_v20  ;;  %v3375_v38 = vcombine.low %v2253_v21, %v2267_v35  ;;  %v2285_v40 = vrot.slane %v2283_v26, 4  ;;  %v1245_v32 = vld [vmem:[%s4167_s20 + $0xc] sm:$0x1]  ;;  %v3415_v12 = vld [vmem:[%s4167_s20 + $0x8] sm:$0xf] }
  0x61   : > { %v2275_v39 = vor.u32 %v2274_v23, %v2271_v29  ;;  %v2286_v41 = vshll.u32 %v3371_v10, 16  ;;  %v887_v42 = vsel %vm4054_vm4, %v882_v27, %v886_v9  ;;  %v2292_v44 = vshll.u32 %v3372_v17, 16  ;;  %v3416_v13 = vld [vmem:[%s4167_s20 + $0xc] sm:$0x1]  ;;  %v3417_v18 = vld [vmem:[%s4167_s20 + $0x10] sm:$0xf] }
  0x62   : > { %v896_v43 = vrot.slane %v895_v36, 4  ;;  %3664 = vmatprep.mubr.msk.bf16.mxu0 %vm361_vm1, %v3375_v38  ;;  %v2280_v47 = vrot.slane %v2278_v34, 5  ;;  %v3459_v30 = vcombine.low %v4237_v45, %v4237_v45  ;;  %v4245_v51 = vrot.slane %v3295_v37, 2  ;;  %v3878_v19 = vld [vmem:[%s4167_s20 + $0x18] ss:$8 sps:$4 sm:$0xff]  }
  0x63   : > { %v2276_v46 = vrot.slane %v2275_v39, 4  ;;  %v2288_v48 = vrot.slane %v2286_v41, 5  ;;  %v2294_v54 = vrot.slane %v2292_v44, 5  ;;  %v1167_v58 = vsel %vm374_vm0, %v4031_v33, 0  ;;  %v3418_v25 = vld [vmem:[%s4167_s20 + $0x14] sm:$0x1] }
  0x64   : > { %v901_v49 = vsel %vm4054_vm4, %v896_v43, %v900_v52  ;;  %v4247_v55 = vrot.slane %v3459_v30, 2  ;;  %v4257_v59 = vsel %vm374_vm0, %v4157_v28, 0  ;;  %v4262_v60 = vsel %vm374_vm0, %v4223_v20, 0  ;;  %v3880_v29 = vld [vmem:[%s4167_s20 + $0x28] ss:$8 sps:$4 sm:$0xff]  }
  0x65   : > { %v3260_v53 = vcombine.low %v887_v42, %v901_v49  ;;  %v2289_v31 = vor.u32 %v2288_v48, %v2285_v40  ;;  %v2281_v56 = vsel %vm4054_vm4, %v2276_v46, %v2280_v47  ;;  %v4266_v61 = vsel %vm374_vm0, %v4237_v45, 0  ;;  %v1246_v52 = vld [vmem:[%s4167_s20 + $0x10] sm:$0xf]  ;;  %v1247_v41 = vld [vmem:[%s4167_s20 + $0x14] sm:$0x1] }
  0x66   : > { %v4273_v33 = vsel %vm374_vm0, %v4245_v51, 0  ;;  %v4277_v28 = vsel %vm374_vm0, %v4247_v55, 0  ;;  %v1259_v6 = vshrl.u32 %v1242_v3, 16  ;;  %v1262_v7 = vshll.u32 %v1242_v3, 16  ;;  %v1248_v47 = vld [vmem:[%s4167_s20 + $0x18] sm:$0xf] }
  0x67   : > { %3585 = vmatmul.mubr.msk.bf16.gmra.mrb[4].mxu1 %vm361_vm1, %v3260_v53  ;;  %v2290_v24 = vrot.slane %v2289_v31, 4  ;;  %v1268_v8 = vshll.u32 %v1243_v4, 16  ;;  %v1273_v9 = vshrl.u32 %v1244_v5, 16  ;;  %v1276_v10 = vshll.u32 %v1244_v5, 16  ;;  %v3881_v48 = vld [vmem:[%s4167_s20 + $0x30] ss:$8 sps:$4 sm:$0xff]  }
  0x68   : > { %3590 = vmatprep.mubr.msk.bf16.mxu1 %vm361_vm1, %v3875_v50  ;;  %v1282_v11 = vshll.u32 %v1245_v32, 16  ;;  %v1261_v14 = vrot.slane %v1259_v6, 4  ;;  %v1264_v15 = vrot.slane %v1262_v7, 5  ;;  %v2655_v26 = vshrl.u32 %v3415_v12, 16  ;;  %v3883_v31 = vld [vmem:[%s4217_s25] ss:$8 sps:$4 sm:$0xff]  }
  0x69   : > { %v2295_v62 = vsel %vm4054_vm4, %v2290_v24, %v2294_v54  ;;  %v1270_v16 = vrot.slane %v1268_v8, 5  ;;  %v1275_v17 = vrot.slane %v1273_v9, 4  ;;  %v1278_v21 = vrot.slane %v1276_v10, 5  ;;  %v1249_v24 = vld [vmem:[%s4167_s20 + $0x1c] sm:$0x1] }
  0x6a   : > { %v3376_v0 = vcombine.low %v2281_v56, %v2295_v62  ;;  %v1284_v22 = vrot.slane %v1282_v11, 5  ;;  %v2658_v27 = vshll.u32 %v3415_v12, 16  ;;  %v1265_v23 = vor.u32 %v1264_v15, %v1261_v14  ;;  %v3420_v6 = vld [vmem:[%s4167_s20 + $0x1c] sm:$0x1]  ;;  %v3882_v7 = vld [vmem:[%s4167_s20 + $0x38] ss:$8 sps:$4 sm:$0xff]  }
  0x6b   : > { %v2664_v34 = vshll.u32 %v3416_v13, 16  ;;  %v2669_v35 = vshrl.u32 %v3417_v18, 16  ;;  %v2672_v36 = vshll.u32 %v3417_v18, 16  ;;  %v1279_v37 = vor.u32 %v1278_v21, %v1275_v17  ;;  %v3421_v11 = vld [vmem:[%s4167_s20 + $0x20] sm:$0xf] }
  0x6c   : > { %3665 = vmatmul.mubr.msk.bf16.gmra.mrb[4].mxu0 %vm361_vm1, %v3376_v0  ;;  %v2657_v38 = vrot.slane %v2655_v26, 4  ;;  %v2660_v39 = vrot.slane %v2658_v27, 5  ;;  %v2678_v40 = vshll.u32 %v3418_v25, 16  ;;  %v1266_v42 = vrot.slane %v1265_v23, 4  ;;  %v3885_v12 = vld [vmem:[%s4217_s25 + $0x8] ss:$8 sps:$4 sm:$0xff]  }
  0x6d   : > { %3670 = vmatprep.mubr.msk.bf16.mxu0 %vm361_vm1, %v3876_v57  ;;  %v2666_v43 = vrot.slane %v2664_v34, 5  ;;  %v2671_v44 = vrot.slane %v2669_v35, 4  ;;  %v2674_v46 = vrot.slane %v2672_v36, 5  ;;  %v1280_v30 = vrot.slane %v1279_v37, 4  ;;  %v3422_v15 = vld [vmem:[%s4167_s20 + $0x24] sm:$0x1] }
  0x6e   : > { %v2661_v49 = vor.u32 %v2660_v39, %v2657_v38  ;;  %v2680_v50 = vrot.slane %v2678_v40, 5  ;;  %v1287_v53 = vshrl.u32 %v1246_v52, 16  ;;  %v1271_v54 = vsel %vm4054_vm4, %v1266_v42, %v1270_v16  ;;  %v1251_v23 = vld [vmem:[%s4167_s20 + $0x24] sm:$0x1]  ;;  %v1252_v37 = vld [vmem:[%s4167_s20 + $0x28] sm:$0xf] }
  0x6f   : > { %3591 = vmatmul.mubr.msk.bf16.vlgmr.msra.gmra.mrb[0].mxu1 %vm361_vm1, %v3877_v63  ;;  %v2675_v56 = vor.u32 %v2674_v46, %v2671_v44  ;;  %v1296_v57 = vshll.u32 %v1247_v41, 16  ;;  %v1301_v0 = vshrl.u32 %v1248_v47, 16  ;;  %v1304_v10 = vshll.u32 %v1248_v47, 16  ;;  %v3887_v38 = vld [vmem:[%s4217_s25 + $0x10] ss:$8 sps:$4 sm:$0xff]  }
  0x70   : > { %3599 = vmatpush3.bf16.msra.mxu1 %v1167_v58  ;;  %3594 = vmatprep.mubr.msk.bf16.mxu1 %vm361_vm1, %v3879_v2  ;;  %v1285_v58 = vsel %vm4054_vm4, %v1280_v30, %v1284_v22  ;;  %v2662_v62 = vrot.slane %v2661_v49, 4  ;;  %v1289_v63 = vrot.slane %v1287_v53, 4  ;;  %v3419_v2 = vld [vmem:[%s4167_s20 + $0x18] sm:$0xf]  ;;  %v2692_v21 = vshll.u32 %v3420_v6, 16 }
  0x71   : > { %3834 = vmatprep.subr.msk.bf16.mxu1 %vm374_vm0, %v4223_v20  ;;  %v1290_v20 = vshll.u32 %v1246_v52, 16  ;;  %v4310_v3 = vcombine.low %v1271_v54, %v1285_v58  ;;  %v2676_v4 = vrot.slane %v2675_v56, 4  ;;  %v1298_v32 = vrot.slane %v1296_v57, 5  ;;  %v1250_v22 = vld [vmem:[%s4167_s20 + $0x20] sm:$0xf] }
  0x72   : > { %v2667_v8 = vsel %vm4054_vm4, %v2662_v62, %v2666_v43  ;;  %v1303_v9 = vrot.slane %v1301_v0, 4  ;;  %v2683_v16 = vshrl.u32 %v3419_v2, 16  ;;  %v2686_v17 = vshll.u32 %v3419_v2, 16  ;;  %v3889_v39 = vld [vmem:[%s4217_s25 + $0x20] ss:$8 sps:$4 sm:$0xff]  }
  0x73   : > { %v1292_v5 = vrot.slane %v1290_v20, 5  ;;  %v2681_v13 = vsel %vm4054_vm4, %v2676_v4, %v2680_v50  ;;  %v1306_v18 = vrot.slane %v1304_v10, 5  ;;  %v2694_v35 = vrot.slane %v2692_v21, 5  ;;  %v3423_v54 = vld [vmem:[%s4167_s20 + $0x28] sm:$0xf] }
  0x74   : > { %3671 = vmatmul.mubr.msk.bf16.vlgmr.msra.gmra.mrb[0].mxu0 %vm361_vm1, %v3878_v19  ;;  %v2685_v26 = vrot.slane %v2683_v16, 4  ;;  %v2688_v27 = vrot.slane %v2686_v17, 5  ;;  %v2700_v36 = vshll.u32 %v3421_v11, 16  ;;  %v2706_v52 = vshll.u32 %v3422_v15, 16  ;;  %v3424_v58 = vld [vmem:[%s4167_s20 + $0x2c] sm:$0x1] }
  0x75   : > { %3679 = vmatpush3.bf16.msra.mxu0 %v4257_v59  ;;  %3674 = vmatprep.mubr.msk.bf16.mxu0 %vm361_vm1, %v3880_v29  ;;  %v1310_v59 = vshll.u32 %v1249_v24, 16  ;;  %v1293_v14 = vor.u32 %v1292_v5, %v1289_v63  ;;  %v2697_v29 = vshrl.u32 %v3421_v11, 16  ;;  %v1307_v34 = vor.u32 %v1306_v18, %v1303_v9  ;;  %v3425_v62 = vld [vmem:[%s4167_s20 + $0x30] sm:$0xf]  ;;  %v3888_v63 = vld [vmem:[%s4217_s25 + $0x18] ss:$8 sps:$4 sm:$0xff]  }
  0x76   : > { %3842 = vmatprep.subr.msk.bf16.mxu0 %vm374_vm0, %v4237_v45  ;;  %v4325_v45 = vcombine.low %v2667_v8, %v2681_v13  ;;  %v2689_v41 = vor.u32 %v2688_v27, %v2685_v26  ;;  %v1315_v43 = vshrl.u32 %v1250_v22, 16  ;;  %v2702_v46 = vrot.slane %v2700_v36, 5  ;;  %v3891_v10 = vld [vmem:[%s4217_s25 + $0x30] ss:$8 sps:$4 sm:$0xff]  }
  0x77   : > { %3595 = vmatmul.mubr.msk.bf16.gmra.mrb[4].mxu1 %vm361_vm1, %v3881_v48  ;;  %v1312_v19 = vrot.slane %v1310_v59, 5  ;;  %v1294_v25 = vrot.slane %v1293_v14, 4  ;;  %v2699_v42 = vrot.slane %v2697_v29, 4  ;;  %v1308_v44 = vrot.slane %v1307_v34, 4  ;;  %v1253_v48 = vld [vmem:[%s4167_s20 + $0x2c] sm:$0x1] }
  0x78   : > { %3600 = vmatprep.mubr.msk.bf16.mxu1 %vm361_vm1, %v3883_v31  ;;  %v2708_v47 = vrot.slane %v2706_v52, 5  ;;  %v1318_v30 = vshll.u32 %v1250_v22, 16  ;;  %v2690_v49 = vrot.slane %v2689_v41, 4  ;;  %v1317_v50 = vrot.slane %v1315_v43, 4  ;;  %v3426_v59 = vld [vmem:[%s4167_s20 + $0x34] sm:$0x1] }
  0x79   : > { %v1299_v40 = vsel %vm4054_vm4, %v1294_v25, %v1298_v32  ;;  %v1324_v53 = vshll.u32 %v1251_v23, 16  ;;  %v1329_v31 = vshrl.u32 %v1252_v37, 16  ;;  %v1313_v56 = vsel %vm4054_vm4, %v1308_v44, %v1312_v19  ;;  %v3890_v32 = vld [vmem:[%s4217_s25 + $0x28] ss:$8 sps:$4 sm:$0xff]   ;;  %v1255_v19 = vld [vmem:[%s4167_s20 + $0x34] sm:$0x1] }
  0x7a   : > { %v2703_v24 = vor.u32 %v2702_v46, %v2699_v42  ;;  %v1320_v20 = vrot.slane %v1318_v30, 5  ;;  %v1332_v57 = vshll.u32 %v1252_v37, 16  ;;  %v4344_v0 = vcombine.low %v1299_v40, %v1313_v56  ;;  %v1254_v18 = vld [vmem:[%s4167_s20 + $0x30] sm:$0xf]  ;;  %v1256_v26 = vld [vmem:[%s4167_s20 + $0x38] sm:$0xf] }
  0x7b   : > { %v2695_v2 = vsel %vm4054_vm4, %v2690_v49, %v2694_v35  ;;  %v1326_v4 = vrot.slane %v1324_v53, 5  ;;  %v1331_v5 = vrot.slane %v1329_v31, 4  ;;  %v1338_v9 = vshll.u32 %v1253_v48, 16  ;;  %v1257_v52 = vld [vmem:[%s4167_s20 + $0x3c] sm:$0x1] }
  0x7c   : > { %3675 = vmatmul.mubr.msk.bf16.gmra.mrb[4].mxu0 %vm361_vm1, %v3882_v7  ;;  %v2704_v6 = vrot.slane %v2703_v24, 4  ;;  %v1321_v7 = vor.u32 %v1320_v20, %v1317_v50  ;;  %v1334_v8 = vrot.slane %v1332_v57, 5  ;;  %v2711_v11 = vshrl.u32 %v3423_v54, 16  ;;  %v3428_v30 = vld [vmem:[%s4167_s20 + $0x3c] sm:$0x1] }
  0x7d   : > { %3680 = vmatprep.mubr.msk.bf16.mxu0 %vm361_vm1, %v3885_v12  ;;  %v2714_v12 = vshll.u32 %v3423_v54, 16  ;;  %v2720_v13 = vshll.u32 %v3424_v58, 16  ;;  %v2725_v14 = vshrl.u32 %v3425_v62, 16  ;;  %v1340_v17 = vrot.slane %v1338_v9, 5  ;;  %v3429_v31 = vld [vmem:[%s4167_s20 + $0x40] sm:$0xf] }
  0x7e   : > { %v1322_v15 = vrot.slane %v1321_v7, 4  ;;  %v1335_v16 = vor.u32 %v1334_v8, %v1331_v5  ;;  %v2713_v22 = vrot.slane %v2711_v11, 4  ;;  %v2728_v34 = vshll.u32 %v3425_v62, 16  ;;  %v3430_v62 = vld [vmem:[%s4167_s20 + $0x44] sm:$0x1] }
  0x7f   : > { %3601 = vmatmul.mubr.msk.bf16.vlgmr.msra.gmra.mrb[0].mxu1 %vm361_vm1, %v3887_v38  ;;  %v2722_v25 = vrot.slane %v2720_v13, 5  ;;  %v2727_v23 = vrot.slane %v2725_v14, 4  ;;  %v2734_v36 = vshll.u32 %v3426_v59, 16  ;;  %v1343_v37 = vshrl.u32 %v1254_v18, 16  ;;  %v1471_v59 = vld [vmem:[%s4217_s25 + $0x4] sm:$0x1] }
  0x80   : > { %3609 = vmatpush3.bf16.msra.mxu1 %v4262_v60  ;;  %3604 = vmatprep.mubr.msk.bf16.mxu1 %vm361_vm1, %v3889_v39  ;;  %v2709_v60 = vsel %vm4054_vm4, %v2704_v6, %v2708_v47  ;;  %v1327_v27 = vsel %vm4054_vm4, %v1322_v15, %v1326_v4  ;;  %v1336_v29 = vrot.slane %v1335_v16, 4  ;;  %v1346_v38 = vshll.u32 %v1254_v18, 16  ;;  %v3892_v39 = vld [vmem:[%s4217_s25 + $0x38] ss:$8 sps:$4 sm:$0xff]  }
  0x81   : > { %3835 = vmatprep.subr.msk.bf16.mxu1 %vm374_vm0, %v4245_v51  ;;  %v4359_v21 = vcombine.low %v2695_v2, %v2709_v60  ;;  %v2716_v51 = vrot.slane %v2714_v12, 5  ;;  %v2730_v41 = vrot.slane %v2728_v34, 5  ;;  %v1352_v42 = vshll.u32 %v1255_v19, 16  ;;  %v1470_v6 = vld [vmem:[%s4217_s25] sm:$0xf] }
  0x82   : > { %v1341_v40 = vsel %vm4054_vm4, %v1336_v29, %v1340_v17  ;;  %v1357_v43 = vshrl.u32 %v1256_v26, 16  ;;  %v2736_v47 = vrot.slane %v2734_v36, 5  ;;  %v1345_v48 = vrot.slane %v1343_v37, 4  ;;  %v1472_v60 = vld [vmem:[%s4217_s25 + $0x8] sm:$0xf] }
  0x83   : > { %v2717_v35 = vor.u32 %v2716_v51, %v2713_v22  ;;  %v3285_v44 = vcombine.low %v1327_v27, %v1341_v40  ;;  %v1348_v49 = vrot.slane %v1346_v38, 5  ;;  %v1354_v50 = vrot.slane %v1352_v42, 5  ;;  %v1473_v51 = vld [vmem:[%s4217_s25 + $0xc] sm:$0x1]  ;;  %v3439_v34 = vld [vmem:[%s4217_s25 + $0x8] sm:$0xf] }
  0x84   : > { %3681 = vmatmul.mubr.msk.bf16.vlgmr.msra.gmra.mrb[0].mxu0 %vm361_vm1, %v3888_v63  ;;  %v1359_v53 = vrot.slane %v1357_v43, 4  ;;  %v1360_v56 = vshll.u32 %v1256_v26, 16  ;;  %v1366_v24 = vshll.u32 %v1257_v52, 16  ;;  %v2748_v2 = vshll.u32 %v3428_v30, 16  ;;  %v3441_v37 = vld [vmem:[%s4217_s25 + $0x10] sm:$0xf] }
  0x85   : > { %3689 = vmatpush3.bf16.msra.mxu0 %v4266_v61  ;;  %3684 = vmatprep.mubr.msk.bf16.mxu0 %vm361_vm1, %v3890_v32  ;;  %v3427_v61 = vld [vmem:[%s4167_s20 + $0x38] sm:$0xf]  ;;  %v2718_v46 = vrot.slane %v2717_v35, 4  ;;  %v1349_v58 = vor.u32 %v1348_v49, %v1345_v48  ;;  %v2753_v32 = vshrl.u32 %v3429_v31, 16  ;;  %v2756_v14 = vshll.u32 %v3429_v31, 16 }
  0x86   : > { %3843 = vmatprep.subr.msk.bf16.mxu0 %vm374_vm0, %v4247_v55  ;;  %v2731_v55 = vor.u32 %v2730_v41, %v2727_v23  ;;  %v2739_v20 = vshrl.u32 %v3427_v61, 16  ;;  %v2742_v63 = vshll.u32 %v3427_v61, 16  ;;  %v1362_v4 = vrot.slane %v1360_v56, 5  ;;  %v3440_v41 = vld [vmem:[%s4217_s25 + $0xc] sm:$0x1] }
  0x87   : > { %3605 = vmatmul.mubr.msk.bf16.gmra.mrb[4].mxu1 %vm361_vm1, %v3891_v10  ;;  %v2723_v54 = vsel %vm4054_vm4, %v2718_v46, %v2722_v25  ;;  %v1350_v8 = vrot.slane %v1349_v58, 4  ;;  %v2750_v10 = vrot.slane %v2748_v2, 5  ;;  %v2755_v13 = vrot.slane %v2753_v32, 4  ;;  %v1474_v31 = vld [vmem:[%s4217_s25 + $0x10] sm:$0xf] }
  0x88   : > { %3610 = vmatprep.mubr.msk.bf16.mxu1 %vm361_vm1, %v4310_v3  ;;  %v2732_v57 = vrot.slane %v2731_v55, 4  ;;  %v1368_v3 = vrot.slane %v1366_v24, 5  ;;  %v2741_v5 = vrot.slane %v2739_v20, 4  ;;  %v2744_v9 = vrot.slane %v2742_v63, 5  ;;  %v1475_v20 = vld [vmem:[%s4217_s25 + $0x14] sm:$0x1] }
  0x89   : > { %v1363_v12 = vor.u32 %v1362_v4, %v1359_v53  ;;  %v1355_v15 = vsel %vm4054_vm4, %v1350_v8, %v1354_v50  ;;  %v2762_v17 = vshll.u32 %v3430_v62, 16  ;;  %v1487_v18 = vshrl.u32 %v1470_v6, 16 }
  0x8a   : > { %v2737_v7 = vsel %vm4054_vm4, %v2732_v57, %v2736_v47  ;;  %v2745_v16 = vor.u32 %v2744_v9, %v2741_v5  ;;  %v2758_v22 = vrot.slane %v2756_v14, 5  ;;  %v1496_v25 = vshll.u32 %v1471_v59, 16  ;;  %v3442_v47 = vld [vmem:[%s4217_s25 + $0x14] sm:$0x1]  ;;  %v1476_v57 = vld [vmem:[%s4217_s25 + $0x18] sm:$0xf] }
  0x8b   : > { %v3433_v11 = vcombine.low %v2723_v54, %v2737_v7  ;;  %v1364_v19 = vrot.slane %v1363_v12, 4  ;;  %v2764_v27 = vrot.slane %v2762_v17, 5  ;;  %v1489_v29 = vrot.slane %v1487_v18, 4  ;;  %v1477_v7 = vld [vmem:[%s4217_s25 + $0x1c] sm:$0x1] }
  0x8c   : > { %3685 = vmatmul.mubr.msk.bf16.gmra.mrb[4].mxu0 %vm361_vm1, %v3892_v39  ;;  %v2746_v26 = vrot.slane %v2745_v16, 4  ;;  %v1501_v23 = vshrl.u32 %v1472_v60, 16  ;;  %v1498_v52 = vrot.slane %v1496_v25, 5  ;;  %v1504_v40 = vshll.u32 %v1472_v60, 16  ;;  %v3444_v17 = vld [vmem:[%s4217_s25 + $0x1c] sm:$0x1] }
  0x8d   : > { %3690 = vmatprep.mubr.msk.bf16.mxu0 %vm361_vm1, %v4325_v45  ;;  %v1490_v45 = vshll.u32 %v1470_v6, 16  ;;  %v1369_v35 = vsel %vm4054_vm4, %v1364_v19, %v1368_v3  ;;  %v1510_v61 = vshll.u32 %v1473_v51, 16  ;;  %v2886_v48 = vshll.u32 %v3439_v34, 16  ;;  %v3445_v18 = vld [vmem:[%s4217_s25 + $0x20] sm:$0xf] }
  0x8e   : > { %v3286_v38 = vcombine.low %v1355_v15, %v1369_v35  ;;  %v1503_v39 = vrot.slane %v1501_v23, 4  ;;  %v1506_v46 = vrot.slane %v1504_v40, 5  ;;  %v2897_v30 = vshrl.u32 %v3441_v37, 16  ;;  %v3446_v25 = vld [vmem:[%s4217_s25 + $0x24] sm:$0x1] }
  0x8f   : > { %3611 = vmatmul.mubr.msk.bf16.vlgmr.msra.gmra.mrb[0].mxu1 %vm361_vm1, %v4344_v0  ;;  %v2759_v0 = vor.u32 %v2758_v22, %v2755_v13  ;;  %v1492_v36 = vrot.slane %v1490_v45, 5  ;;  %v2892_v53 = vshll.u32 %v3440_v41, 16  ;;  %v2888_v24 = vrot.slane %v2886_v48, 5  ;;  %v3443_v13 = vld [vmem:[%s4217_s25 + $0x18] sm:$0xf] }
  0x90   : > { %3619 = vmatpush3.bf16.msra.mxu1 %v4273_v33  ;;  %3614 = vmatprep.mubr.msk.bf16.mxu1 %vm361_vm1, %v3285_v44  ;;  %v2751_v33 = vsel %vm4054_vm4, %v2746_v26, %v2750_v10  ;;  %v2883_v44 = vshrl.u32 %v3439_v34, 16  ;;  %v1507_v56 = vor.u32 %v1506_v46, %v1503_v39  ;;  %v2899_v58 = vrot.slane %v2897_v30, 4  ;;  %v1478_v34 = vld [vmem:[%s4217_s25 + $0x20] sm:$0xf]  ;;  %v1480_v41 = vld [vmem:[%s4217_s25 + $0x28] sm:$0xf] }
  0x91   : > { %v2760_v42 = vrot.slane %v2759_v0, 4  ;;  %v1493_v43 = vor.u32 %v1492_v36, %v1489_v29  ;;  %v2900_v62 = vshll.u32 %v3441_v37, 16  ;;  %v2906_v63 = vshll.u32 %v3442_v47, 16  ;;  %v1479_v37 = vld [vmem:[%s4217_s25 + $0x24] sm:$0x1] }
  0x92   : > { %v2885_v50 = vrot.slane %v2883_v44, 4  ;;  %v1508_v2 = vrot.slane %v1507_v56, 4  ;;  %v1515_v3 = vshrl.u32 %v1474_v31, 16  ;;  %v1518_v5 = vshll.u32 %v1474_v31, 16 }
  0x93   : > { %v2765_v55 = vsel %vm4054_vm4, %v2760_v42, %v2764_v27  ;;  %v1494_v49 = vrot.slane %v1493_v43, 4  ;;  %v2894_v32 = vrot.slane %v2892_v53, 5  ;;  %v2902_v6 = vrot.slane %v2900_v62, 5 }
  0x94   : > { %3691 = vmatmul.mubr.msk.bf16.vlgmr.msra.gmra.mrb[0].mxu0 %vm361_vm1, %v4359_v21  ;;  %v3434_v54 = vcombine.low %v2751_v33, %v2765_v55  ;;  %v1512_v21 = vrot.slane %v1510_v61, 5  ;;  %v2889_v4 = vor.u32 %v2888_v24, %v2885_v50  ;;  %v1524_v8 = vshll.u32 %v1475_v20, 16  ;;  %v3447_v20 = vld [vmem:[%s4217_s25 + $0x28] sm:$0xf] }
  0x95   : > { %3699 = vmatpush3.bf16.msra.mxu0 %v4277_v28  ;;  %3694 = vmatprep.mubr.msk.bf16.mxu0 %vm361_vm1, %v3433_v11  ;;  %v1499_v28 = vsel %vm4054_vm4, %v1494_v49, %v1498_v52  ;;  %v1529_v9 = vshrl.u32 %v1476_v57, 16  ;;  %v1517_v11 = vrot.slane %v1515_v3, 4  ;;  %v1520_v12 = vrot.slane %v1518_v5, 5  ;;  %v1481_v49 = vld [vmem:[%s4217_s25 + $0x2c] sm:$0x1] }
  0x96   : > { %v1513_v10 = vsel %vm4054_vm4, %v1508_v2, %v1512_v21  ;;  %v2890_v59 = vrot.slane %v2889_v4, 4  ;;  %v2903_v60 = vor.u32 %v2902_v6, %v2899_v58  ;;  %v2908_v15 = vrot.slane %v2906_v63, 5  ;;  %v3449_v63 = vld [vmem:[%s4217_s25 + $0x30] sm:$0xf] }
  0x97   : > { %3615 = vmatmul.mubr.msk.bf16.gmra.mrb[4].mxu1 %vm361_vm1, %v3286_v38  ;;  %v3291_v14 = vcombine.low %v1499_v28, %v1513_v10  ;;  %v1526_v16 = vrot.slane %v1524_v8, 5  ;;  %v1521_v19 = vor.u32 %v1520_v12, %v1517_v11  ;;  %v1531_v22 = vrot.slane %v1529_v9, 4  ;;  %v3450_v12 = vld [vmem:[%s4217_s25 + $0x34] sm:$0x1] }
  0x98   : > { %v1532_v51 = vshll.u32 %v1476_v57, 16  ;;  %v1538_v45 = vshll.u32 %v1477_v7, 16  ;;  %v2895_v26 = vsel %vm4054_vm4, %v2890_v59, %v2894_v32  ;;  %v2904_v27 = vrot.slane %v2903_v60, 4  ;;  %v3448_v32 = vld [vmem:[%s4217_s25 + $0x2c] sm:$0x1] }
  0x99   : > { %3620 = vmatprep.mubr.msk.bf16.mxu1 %vm361_vm1, %v3291_v14  ;;  %v2911_v29 = vshrl.u32 %v3443_v13, 16  ;;  %v2914_v23 = vshll.u32 %v3443_v13, 16  ;;  %v1522_v35 = vrot.slane %v1521_v19, 4  ;;  %v2920_v36 = vshll.u32 %v3444_v17, 16  ;;  %v1482_v17 = vld [vmem:[%s4217_s25 + $0x30] sm:$0xf] }
  0x9a   : > { %v1534_v0 = vrot.slane %v1532_v51, 5  ;;  %v2925_v52 = vshrl.u32 %v3445_v18, 16  ;;  %v2909_v38 = vsel %vm4054_vm4, %v2904_v27, %v2908_v15  ;;  %v1540_v33 = vrot.slane %v1538_v45, 5  ;;  %v1484_v45 = vld [vmem:[%s4217_s25 + $0x38] sm:$0xf] }
  0x9b   : > { %v2913_v39 = vrot.slane %v2911_v29, 4  ;;  %v2916_v40 = vrot.slane %v2914_v23, 5  ;;  %v3455_v42 = vcombine.low %v2895_v26, %v2909_v38  ;;  %v1527_v43 = vsel %vm4054_vm4, %v1522_v35, %v1526_v16  ;;  %v1483_v23 = vld [vmem:[%s4217_s25 + $0x34] sm:$0x1] }
  0x9c   : > { %3695 = vmatmul.mubr.msk.bf16.gmra.mrb[4].mxu0 %vm361_vm1, %v3434_v54  ;;  %v1535_v61 = vor.u32 %v1534_v0, %v1531_v22  ;;  %v2927_v44 = vrot.slane %v2925_v52, 4  ;;  %v2928_v47 = vshll.u32 %v3445_v18, 16  ;;  %v2934_v48 = vshll.u32 %v3446_v25, 16 }
  0x9d   : > { %v2917_v46 = vor.u32 %v2916_v40, %v2913_v39  ;;  %v1543_v30 = vshrl.u32 %v1478_v34, 16  ;;  %3700 = vmatprep.mubr.msk.bf16.mxu0 %vm361_vm1, %v3455_v42  ;;  %v1546_v50 = vshll.u32 %v1478_v34, 16  ;;  %v1552_v53 = vshll.u32 %v1479_v37, 16 }
  0x9e   : > { %v1536_v55 = vrot.slane %v1535_v61, 4  ;;  %v1557_v31 = vshrl.u32 %v1480_v41, 16  ;;  %v2922_v56 = vrot.slane %v2920_v36, 5  ;;  %v2930_v21 = vrot.slane %v2928_v47, 5  ;;  %v3451_v61 = vld [vmem:[%s4217_s25 + $0x38] sm:$0xf] }
  0x9f   : > { %v2918_v54 = vrot.slane %v2917_v46, 4  ;;  %v1545_v24 = vrot.slane %v1543_v30, 4  ;;  %v2936_v28 = vrot.slane %v2934_v48, 5  ;;  %v1548_v58 = vrot.slane %v1546_v50, 5  ;;  %v3453_v48 = vld [vmem:[%s4217_s25 + $0x40] sm:$0xf] }
  0xa0   : > { %v1541_v57 = vsel %vm4054_vm4, %v1536_v55, %v1540_v33  ;;  %v1554_v62 = vrot.slane %v1552_v53, 5  ;;  %v2931_v4 = vor.u32 %v2930_v21, %v2927_v44  ;;  %v1559_v3 = vrot.slane %v1557_v31, 4  ;;  %v1485_v33 = vld [vmem:[%s4217_s25 + $0x3c] sm:$0x1] }
  0xa1   : > { %v3292_v2 = vcombine.low %v1527_v43, %v1541_v57  ;;  %v1560_v5 = vshll.u32 %v1480_v41, 16  ;;  %v1549_v6 = vor.u32 %v1548_v58, %v1545_v24  ;;  %v1566_v7 = vshll.u32 %v1481_v49, 16  ;;  %v3452_v53 = vld [vmem:[%s4217_s25 + $0x3c] sm:$0x1] }
  0xa2   : > { %v2939_v8 = vshrl.u32 %v3447_v20, 16  ;;  %v2942_v9 = vshll.u32 %v3447_v20, 16  ;;  %v2923_v10 = vsel %vm4054_vm4, %v2918_v54, %v2922_v56  ;;  %v2932_v59 = vrot.slane %v2931_v4, 4 }
  0xa3   : > { %3621 = vmatmul.mubr.msk.bf16.vlgmr.msra.gmra.mrb[0].mxu1 %vm361_vm1, %v3292_v2  ;;  %v1562_v11 = vrot.slane %v1560_v5, 5  ;;  %v2953_v13 = vshrl.u32 %v3449_v63, 16  ;;  %v1550_v14 = vrot.slane %v1549_v6, 4  ;;  %v2948_v16 = vshll.u32 %v3448_v32, 16 }
  0xa4   : > { %v2941_v60 = vrot.slane %v2939_v8, 4  ;;  %v2944_v15 = vrot.slane %v2942_v9, 5  ;;  %v2937_v18 = vsel %vm4054_vm4, %v2932_v59, %v2936_v28  ;;  %v1568_v22 = vrot.slane %v1566_v7, 5  ;;  %v3454_v28 = vld [vmem:[%s4217_s25 + $0x44] sm:$0x1] }
  0xa5   : > { %v1563_v19 = vor.u32 %v1562_v11, %v1559_v3  ;;  %v2955_v51 = vrot.slane %v2953_v13, 4  ;;  %v3456_v25 = vcombine.low %v2923_v10, %v2937_v18  ;;  %v1555_v26 = vsel %vm4054_vm4, %v1550_v14, %v1554_v62 }
  0xa6   : > { %v2945_v27 = vor.u32 %v2944_v15, %v2941_v60  ;;  %v2956_v29 = vshll.u32 %v3449_v63, 16  ;;  %v2962_v35 = vshll.u32 %v3450_v12, 16  ;;  %v1571_v0 = vshrl.u32 %v1482_v17, 16 }
  0xa7   : > { %v1564_v34 = vrot.slane %v1563_v19, 4  ;;  %v1574_v36 = vshll.u32 %v1482_v17, 16  ;;  %3701 = vmatmul.mubr.msk.bf16.vlgmr.msra.gmra.mrb[0].mxu0 %vm361_vm1, %v3456_v25  ;;  %v2950_v37 = vrot.slane %v2948_v16, 5  ;;  %v1585_v39 = vshrl.u32 %v1484_v45, 16 }
  0xa8   : > { %v2946_v52 = vrot.slane %v2945_v27, 4  ;;  %v2958_v38 = vrot.slane %v2956_v29, 5  ;;  %v1573_v41 = vrot.slane %v1571_v0, 4  ;;  %v1580_v43 = vshll.u32 %v1483_v23, 16  ;;  %v3464_v29 = vld [vmem:[%s4510_s5] ss:$0 sm:$0xff] }
  0xa9   : > { %v1569_v40 = vsel %vm4054_vm4, %v1564_v34, %v1568_v22  ;;  %v1576_v42 = vrot.slane %v1574_v36, 5  ;;  %v2964_v47 = vrot.slane %v2962_v35, 5  ;;  %v1587_v55 = vrot.slane %v1585_v39, 4 }
  0xaa   : > { %v3293_v44 = vcombine.low %v1555_v26, %v1569_v40  ;;  %v2959_v46 = vor.u32 %v2958_v38, %v2955_v51  ;;  %v1588_v49 = vshll.u32 %v1484_v45, 16  ;;  %v1594_v50 = vshll.u32 %v1485_v33, 16 }
  0xab   : > { %v1577_v30 = vor.u32 %v1576_v42, %v1573_v41  ;;  %v2951_v31 = vsel %vm4054_vm4, %v2946_v52, %v2950_v37  ;;  %v2967_v56 = vshrl.u32 %v3451_v61, 16  ;;  %v2970_v21 = vshll.u32 %v3451_v61, 16 }
  0xac   : > { %3624 = vmatprep.mubr.msk.bf16.mxu1 %vm361_vm1, %v3293_v44  ;;  %v2960_v54 = vrot.slane %v2959_v46, 4  ;;  %v1582_v20 = vrot.slane %v1580_v43, 5  ;;  %v1590_v57 = vrot.slane %v1588_v49, 5  ;;  %v2981_v58 = vshrl.u32 %v3453_v48, 16 }
  0xad   : > { %v1578_v24 = vrot.slane %v1577_v30, 4  ;;  %v2969_v63 = vrot.slane %v2967_v56, 4  ;;  %v2972_v2 = vrot.slane %v2970_v21, 5  ;;  %v2976_v4 = vshll.u32 %v3452_v53, 16 }
  0xae   : > { %v2965_v62 = vsel %vm4054_vm4, %v2960_v54, %v2964_v47  ;;  %v1591_v5 = vor.u32 %v1590_v57, %v1587_v55  ;;  %v1596_v32 = vrot.slane %v1594_v50, 5  ;;  %v2983_v7 = vrot.slane %v2981_v58, 4 }
  0xaf   : > { %v3457_v3 = vcombine.low %v2951_v31, %v2965_v62  ;;  %v2973_v6 = vor.u32 %v2972_v2, %v2969_v63  ;;  %v2984_v8 = vshll.u32 %v3453_v48, 16  ;;  %v2990_v9 = vshll.u32 %v3454_v28, 16 }
  0xb0   : > { %v1583_v10 = vsel %vm4054_vm4, %v1578_v24, %v1582_v20  ;;  %v1592_v59 = vrot.slane %v1591_v5, 4  ;;  %v2978_v12 = vrot.slane %v2976_v4, 5 }
  0xb1   : > { %3704 = vmatprep.mubr.msk.bf16.mxu0 %vm361_vm1, %v3457_v3  ;;  %v2974_v11 = vrot.slane %v2973_v6, 4  ;;  %v2986_v13 = vrot.slane %v2984_v8, 5  ;;  %v2992_v16 = vrot.slane %v2990_v9, 5 }
  0xb2   : > { %v1597_v14 = vsel %vm4054_vm4, %v1592_v59, %v1596_v32 }
  0xb3   : > { %v3294_v60 = vcombine.low %v1583_v10, %v1597_v14  ;;  %v2987_v15 = vor.u32 %v2986_v13, %v2983_v7  ;;  %v2979_v17 = vsel %vm4054_vm4, %v2974_v11, %v2978_v12 }
  0xb5   : > { %3625 = vmatmul.mubr.msk.bf16.gmra.mrb[4].mxu1 %vm361_vm1, %v3294_v60  ;;  %v2988_v18 = vrot.slane %v2987_v15, 4 }
  0xb7   : > { %v2993_v19 = vsel %vm4054_vm4, %v2988_v18, %v2992_v16 }
  0xb8   : > { %v3458_v22 = vcombine.low %v2979_v17, %v2993_v19 }
  0xba   : > { %3705 = vmatmul.mubr.msk.bf16.gmra.mrb[4].mxu0 %vm361_vm1, %v3458_v22 }
 0x176   : > { %v3622_v51 = vpop.f32.mrb[0].mxu1 }
 0x177   : > { %v1663_v45 = vpop.f32.mrb[1].mxu1 }
 0x178   : > { %v3623_v25 = vpop.f32.mrb[2].mxu1 }
 0x179   : > { %v1666_v26 = vpop.f32.mrb[3].mxu1 }
 0x17a   : > { %v3702_v27 = vpop.f32.mrb[0].mxu0 }
 0x17b   : > { %v3708_v23 = vadd.f32 %v3702_v27, %v3622_v51  ;;  %v3059_v34 = vpop.f32.mrb[1].mxu0 }
 0x17c   : > { %v3709_v35 = vadd.f32 %v3059_v34, %v1663_v45  ;;  %v3703_v0 = vpop.f32.mrb[2].mxu0 }
 0x17d   : > { %v3107_v36 = vadd.f32 %v3708_v23, %v3464_v29  ;;  %v3710_v1 = vadd.f32 %v3703_v0, %v3623_v25  ;;  %v3062_v52 = vpop.f32.mrb[3].mxu0 }
 0x17e   : > { %v3105_v37 = vadd.f32 %v3709_v35, %v3464_v29  ;;  %v3711_v38 = vadd.f32 %v3062_v52, %v1666_v26 }
 0x17f   : > { %v3115_v33 = vmax.f32 %v3107_v36, 0.0  ;;  %v3108_v39 = vadd.f32 %v3710_v1, %v3464_v29 }
 0x180   : > { %v3113_v40 = vmax.f32 %v3105_v37, 0.0  ;;  %v3106_v41 = vadd.f32 %v3711_v38, %v3464_v29 }
 0x181   : > { %3124 = vst.msk [vmem:[%s4484_s11 + $0x10] sm:$0xff] %vm3121_vm5, %v3115_v33  ;;  %v3116_v42 = vmax.f32 %v3108_v39, 0.0 }
 0x182   : > { %3122 = vst.msk [vmem:[%s4484_s11] sm:$0xff] %vm3121_vm5, %v3113_v40  ;;  %v3114_v43 = vmax.f32 %v3106_v41, 0.0 }
 0x183   : > { %3125 = vst.msk [vmem:[%s4484_s11 + $0x18] sm:$0xff] %vm3121_vm5, %v3116_v42 }
 0x184   : > { %3123 = vst.msk [vmem:[%s4484_s11 + $0x8] sm:$0xff] %vm3121_vm5, %v3114_v43 }
 0x188   : > { %v3626_v61 = vpop.f32.mrb[4].mxu1 }
 0x189   : > { %v1679_v44 = vpop.f32.mrb[5].mxu1 }
 0x18a   : > { %v3627_v46 = vpop.f32.mrb[6].mxu1 }
 0x18b   : > { %v1682_v47 = vpop.f32.mrb[7].mxu1 }
 0x18d   : > { %v3706_v48 = vpop.f32.mrb[4].mxu0 }
 0x18e   : > { %v3712_v30 = vadd.f32 %v3706_v48, %v3626_v61  ;;  %v3075_v55 = vpop.f32.mrb[5].mxu0 }
 0x18f   : > { %v3713_v49 = vadd.f32 %v3075_v55, %v1679_v44  ;;  %v3707_v50 = vpop.f32.mrb[6].mxu0 }
 0x190   : > { %v3111_v53 = vadd.f32 %v3712_v30, %v3464_v29  ;;  %v3714_v31 = vadd.f32 %v3707_v50, %v3627_v46  ;;  %v3078_v54 = vpop.f32.mrb[7].mxu0 }
 0x191   : > { %v3109_v56 = vadd.f32 %v3713_v49, %v3464_v29  ;;  %v3715_v21 = vadd.f32 %v3078_v54, %v1682_v47 }
 0x192   : > { %v3119_v24 = vmax.f32 %v3111_v53, 0.0  ;;  %v3112_v20 = vadd.f32 %v3714_v31, %v3464_v29 }
 0x193   : > { %v3117_v57 = vmax.f32 %v3109_v56, 0.0  ;;  %v3110_v28 = vadd.f32 %v3715_v21, %v3464_v29 }
 0x194   : > { %3128 = vst.msk [vmem:[%s4484_s11 + $0x30] sm:$0xff] %vm3121_vm5, %v3119_v24  ;;  %v3120_v58 = vmax.f32 %v3112_v20, 0.0 }
 0x195   : > { %3126 = vst.msk [vmem:[%s4484_s11 + $0x20] sm:$0xff] %vm3121_vm5, %v3117_v57  ;;  %v3118_v62 = vmax.f32 %v3110_v28, 0.0 }
 0x196   : > { %3129 = vst.msk [vmem:[%s4484_s11 + $0x38] sm:$0xff] %vm3121_vm5, %v3120_v58 }
 0x197   : > { %3127 = vst.msk [vmem:[%s4484_s11 + $0x28] sm:$0xff] %vm3121_vm5, %v3118_v62 }
 0x198 PF: > { %s16_s21 = sadd.s32 1, %s3899_s21  }
 0x199   : > { %p13_p4 = scmp.ge.s32.totalorder %s16_s21, 4  }
 0x19b   :  { %15 = sbr.rel (!%p13_p4) target bundleno = 1 (0x1), region = 87 }

</bundles_post_ra>
